<compile_context>
chip_gen: v5e
topology: v5e:2x2
jax: 0.10.0
libtpu: 0.0.40
codegen_flags: <defaults>
</compile_context>

<pallas_src>
import jax
import jax.numpy as jnp
from jax.experimental import pallas as pl
from jax.experimental.pallas import tpu as pltpu

# ---------------- configuration (small, TPU-friendly shapes) ----------------
BATCH = 2
SEQ = 16
EMBED = 128
NUM_HEADS = 4
HEAD_DIM = EMBED // NUM_HEADS
FWD_EXP = 4
HIDDEN = FWD_EXP * EMBED
LN_EPS = 1e-5

# bf16 operands / f32 accumulation on the MXU.
_COMPUTE_DTYPE = jnp.bfloat16

# TODO(synk): nn.Dropout is implemented as identity (p=0.0 / eval semantics);
# stochastic training-mode dropout is not reproduced.


# ------------------------------- kernel -------------------------------------
def _transformer_block_kernel(
    xq_ref, xk_ref, xv_ref, bias_ref, seg_ref,        # activations + masks
    wq_ref, wk_ref, wv_ref, wfc_ref,                  # attention weights
    g1_ref, be1_ref, w0_ref, b0_ref, w1_ref, b1_ref,  # LN1 + FFN params
    g2_ref, be2_ref,                                  # LN2 params
    out_ref,
):
    cdt = wq_ref.dtype                        # matmul operand dtype (bf16)
    nt_t = (((1,), (1,)), ((), ()))           # dot_general numbers for a @ b.T

    rows = xq_ref.shape[0]                    # R = B*S
    heads = seg_ref.shape[0] // rows          # H

    q_in = xq_ref[...]                        # (R, E) f32, kept for residual

    # --- fused full-width projections (N = E = 128, one MXU call each) ------
    q = jnp.dot(q_in.astype(cdt), wq_ref[...],            # 1/sqrt(E) folded in
                preferred_element_type=jnp.float32)
    k = jnp.dot(xk_ref[...].astype(cdt), wk_ref[...],
                preferred_element_type=jnp.float32)
    v = jnp.dot(xv_ref[...].astype(cdt), wv_ref[...],
                preferred_element_type=jnp.float32)

    # --- head-stacked K / V: tile along sublanes, zero other heads' lanes ---
    seg = seg_ref[...]                                      # (H*R, E) f32 0/1
    k_exp = (jnp.concatenate([k] * heads, axis=0) * seg).astype(cdt)
    v_exp = (jnp.concatenate([v] * heads, axis=0) * seg).astype(cdt)

    # --- block attention: all (batch, head) pairs in one lane-dense pass ----
    # logits[r1, h*R + r2] = q[r1] . k[r2] restricted to head h's lanes
    logits = jax.lax.dot_general(q.astype(cdt), k_exp, nt_t,
                                 preferred_element_type=jnp.float32)
    logits = logits + bias_ref[...]           # 0 / -1e20 (batch-block + mask)
    # The per-row max is constant across each head segment's lanes, so
    # subtracting it leaves every per-(batch, head) softmax exact.
    logits = logits - jnp.max(logits, axis=-1, keepdims=True)
    p = jnp.exp(logits).astype(cdt)                         # (R, H*R)

    ctx_un = jnp.dot(p, v_exp, preferred_element_type=jnp.float32)   # (R, E)
    denom = jnp.dot(p, seg.astype(cdt),                               # per-col
                    preferred_element_type=jnp.float32)               # segment sum
    denom = jnp.maximum(denom, 1e-30)          # guard fully-underflowed rows
    ctx = ctx_un * pl.reciprocal(denom, approx=True)                  # (R, E)

    attn = jnp.dot(ctx.astype(cdt), wfc_ref[...],
                   preferred_element_type=jnp.float32)                # (R, E)

    def layer_norm(x, g, b):
        mu = jnp.mean(x, axis=-1, keepdims=True)
        var = jnp.mean(jnp.square(x - mu), axis=-1, keepdims=True)
        return (x - mu) * jax.lax.rsqrt(var + LN_EPS) * g + b

    # --- residual + LN1 ------------------------------------------------------
    x = layer_norm(attn + q_in, g1_ref[...], be1_ref[...])            # (R, E)

    # --- feed-forward: relu(x @ W0^T + b0) @ W1^T + b1 ------------------------
    hdn = jnp.dot(x.astype(cdt), w0_ref[...],
                  preferred_element_type=jnp.float32) + b0_ref[...]
    hdn = jnp.maximum(hdn, 0.0)
    y = jnp.dot(hdn.astype(cdt), w1_ref[...],
                preferred_element_type=jnp.float32) + b1_ref[...]

    # --- residual + LN2 -------------------------------------------------------
    out = layer_norm(x + y, g2_ref[...], be2_ref[...])
    out_ref[...] = out.astype(out_ref.dtype)


# ------------------------------- wrapper -------------------------------------
def _full_spec(shape):
    return pl.BlockSpec(shape, lambda i, _n=len(shape): (0,) * _n)


@jax.jit
def _transformer_block_impl(Q, K, V, mask, params):
    B, S, E = Q.shape
    H, D = NUM_HEADS, HEAD_DIM
    R = B * S
    hid = params["w0"].shape[0]
    cdt = _COMPUTE_DTYPE
    scale = 1.0 / float(E) ** 0.5

    # ---- one-time wrapper-side weight prep (no in-kernel transposes) --------
    wq_t = (jnp.transpose(params["wq"]) * scale).astype(cdt)   # (E, E), scaled
    wk_t = jnp.transpose(params["wk"]).astype(cdt)
    wv_t = jnp.transpose(params["wv"]).astype(cdt)
    wfc_t = jnp.transpose(params["wfc"]).astype(cdt)
    w0_t = jnp.transpose(params["w0"]).astype(cdt)              # (E, HID)
    w1_t = jnp.transpose(params["w1"]).astype(cdt)              # (HID, E)

    # Block-diagonal additive attention bias, (R, H*R):
    # column j = h*R + (b2*S + s2); 0 where same batch AND mask!=0, else -1e20.
    same_b = (jnp.arange(B)[:, None, None, None] ==
              jnp.arange(B)[None, None, :, None])               # (B,1,B,1)
    valid = (mask != 0)[:, :, None, :]                          # (B,S,1,S)
    bd = jnp.logical_and(same_b, valid).reshape(R, R)           # (R, R)
    bias_big = jnp.where(jnp.tile(bd, (1, H)),
                         jnp.float32(0.0), jnp.float32(-1e20))  # (R, H*R)

    # Head-lane segment mask, (H*R, E): row h*R+r has ones on head h's lanes.
    head_of_lane = jnp.arange(E) // D                           # (E,)
    mb = (head_of_lane[None, :] == jnp.arange(H)[:, None])      # (H, E)
    seg = jnp.repeat(mb.astype(jnp.float32), R, axis=0)         # (H*R, E)

    xq = Q.reshape(R, E)
    xk = K.reshape(R, E)
    xv = V.reshape(R, E)

    # Single grid step on all chips: this sub-microsecond workload should not
    # be split across TensorCores (v7x) — everything is one lane-dense block.
    grid_spec = pltpu.PrefetchScalarGridSpec(
        num_scalar_prefetch=0,
        grid=(1,),
        in_specs=[
            _full_spec((R, E)), _full_spec((R, E)), _full_spec((R, E)),
            _full_spec((R, H * R)), _full_spec((H * R, E)),
            _full_spec((E, E)), _full_spec((E, E)),
            _full_spec((E, E)), _full_spec((E, E)),
            _full_spec((1, E)), _full_spec((1, E)),
            _full_spec((E, hid)), _full_spec((1, hid)),
            _full_spec((hid, E)), _full_spec((1, E)),
            _full_spec((1, E)), _full_spec((1, E)),
        ],
        out_specs=_full_spec((R, E)),
    )

    out = pl.pallas_call(
        _transformer_block_kernel,
        out_shape=jax.ShapeDtypeStruct((R, E), jnp.float32),
        grid_spec=grid_spec,
        compiler_params=pltpu.CompilerParams(
            dimension_semantics=("arbitrary",)),
    )(
        xq, xk, xv, bias_big, seg,
        wq_t, wk_t, wv_t, wfc_t,
        params["ln1_g"], params["ln1_b"],
        w0_t, params["b0"], w1_t, params["b1"],
        params["ln2_g"], params["ln2_b"],
    )
    return out.reshape(B, S, E)


def transformer_block(Q, K, V, mask, params):
    return _transformer_block_impl(Q, K, V, mask, params)


# --------------------------- pure-JAX f32 reference ---------------------------
def transformer_block_ref(Q, K, V, mask, params):
    B, S, E = Q.shape
    q = (Q @ params["wq"].T).reshape(B, S, NUM_HEADS, HEAD_DIM)
    k = (K @ params["wk"].T).reshape(B, S, NUM_HEADS, HEAD_DIM)
    v = (V @ params["wv"].T).reshape(B, S, NUM_HEADS, HEAD_DIM)
    energy = jnp.einsum("nqhd,nkhd->nhqk", q, k)
    energy = jnp.where(mask[:, None, :, :] == 0, jnp.float32(-1e20), energy)
    attn = jax.nn.softmax(energy / (E ** 0.5), axis=3)
    out = jnp.einsum("nhql,nlhd->nqhd", attn, v).reshape(B, S, E)
    out = out @ params["wfc"].T

    def ln(x, g, b):
        mu = jnp.mean(x, axis=-1, keepdims=True)
        var = jnp.mean((x - mu) ** 2, axis=-1, keepdims=True)
        return (x - mu) / jnp.sqrt(var + LN_EPS) * g[0] + b[0]

    x = ln(out + Q, params["ln1_g"], params["ln1_b"])
    y = jnp.maximum(x @ params["w0"].T + params["b0"][0], 0.0)
    y = y @ params["w1"].T + params["b1"][0]
    return ln(x + y, params["ln2_g"], params["ln2_b"])


# ---------------------------------- main --------------------------------------
if __name__ == "__main__":
    key = jax.random.PRNGKey(0)
    keys = jax.random.split(key, 12)

    Q = jax.random.normal(keys[0], (BATCH, SEQ, EMBED), jnp.float32)
    K = jax.random.normal(keys[1], (BATCH, SEQ, EMBED), jnp.float32)
    V = jax.random.normal(keys[2], (BATCH, SEQ, EMBED), jnp.float32)
    # causal mask, broadcast over heads (per-batch mask kept general)
    mask = jnp.broadcast_to(
        jnp.tril(jnp.ones((SEQ, SEQ), jnp.float32)), (BATCH, SEQ, SEQ))

    s_e = 1.0 / (EMBED ** 0.5)
    s_h = 1.0 / (HIDDEN ** 0.5)
    params = {
        "wq": jax.random.normal(keys[3], (EMBED, EMBED), jnp.float32) * s_e,
        "wk": jax.random.normal(keys[4], (EMBED, EMBED), jnp.float32) * s_e,
        "wv": jax.random.normal(keys[5], (EMBED, EMBED), jnp.float32) * s_e,
        "wfc": jax.random.normal(keys[6], (EMBED, EMBED), jnp.float32) * s_e,
        "ln1_g": jnp.ones((1, EMBED), jnp.float32),
        "ln1_b": jnp.zeros((1, EMBED), jnp.float32),
        "w0": jax.random.normal(keys[7], (HIDDEN, EMBED), jnp.float32) * s_e,
        "b0": jax.random.normal(keys[8], (1, HIDDEN), jnp.float32) * 0.01,
        "w1": jax.random.normal(keys[9], (EMBED, HIDDEN), jnp.float32) * s_h,
        "b1": jax.random.normal(keys[10], (1, EMBED), jnp.float32) * 0.01,
        "ln2_g": jnp.ones((1, EMBED), jnp.float32),
        "ln2_b": jnp.zeros((1, EMBED), jnp.float32),
    }

    out = transformer_block(Q, K, V, mask, params)
    out = jax.block_until_ready(out)

    ref = transformer_block_ref(Q, K, V, mask, params)
    assert out.shape == (BATCH, SEQ, EMBED)
    # Kernel uses bf16 MXU operands (f32 accumulation) + approx reciprocal in
    # the softmax; vs. the pure-f32 reference the expected drift is ~1e-2 on
    # unit-variance LayerNorm outputs.  With _COMPUTE_DTYPE = jnp.float32 the
    # agreement is ~1e-4.
    max_err = float(jnp.max(jnp.abs(out - ref)))
    assert max_err < 7.5e-2, max_err

    print("KERNEL_OK")
</pallas_src>

<mosaic_0001>
module attributes {stable_mosaic.version = 11 : i64} {
  func.func @_transformer_block_kernel(%arg0: i32, %arg1: memref<32x128xf32, #tpu.memory_space<vmem>>, %arg2: memref<32x128xf32, #tpu.memory_space<vmem>>, %arg3: memref<32x128xf32, #tpu.memory_space<vmem>>, %arg4: memref<32x128xf32, #tpu.memory_space<vmem>>, %arg5: memref<128x128xf32, #tpu.memory_space<vmem>>, %arg6: memref<128x128xbf16, #tpu.memory_space<vmem>>, %arg7: memref<128x128xbf16, #tpu.memory_space<vmem>>, %arg8: memref<128x128xbf16, #tpu.memory_space<vmem>>, %arg9: memref<128x128xbf16, #tpu.memory_space<vmem>>, %arg10: memref<1x128xf32, #tpu.memory_space<vmem>>, %arg11: memref<1x128xf32, #tpu.memory_space<vmem>>, %arg12: memref<128x512xbf16, #tpu.memory_space<vmem>>, %arg13: memref<1x512xf32, #tpu.memory_space<vmem>>, %arg14: memref<512x128xbf16, #tpu.memory_space<vmem>>, %arg15: memref<1x128xf32, #tpu.memory_space<vmem>>, %arg16: memref<1x128xf32, #tpu.memory_space<vmem>>, %arg17: memref<1x128xf32, #tpu.memory_space<vmem>>, %arg18: memref<32x128xf32, #tpu.memory_space<vmem>>) attributes {dimension_semantics = [#tpu.dimension_semantics<arbitrary>], iteration_bounds = array<i64: 1>, scalar_prefetch = 0 : i64, scratch_operands = 0 : i64, tpu.core_type = #tpu.core_type<tc>, window_params = [{pipeline_mode = #tpu.pipeline_mode<synchronous>, transform_indices = @transform_0, window_bounds = array<i64: 32, 128>}, {pipeline_mode = #tpu.pipeline_mode<synchronous>, transform_indices = @transform_1, window_bounds = array<i64: 32, 128>}, {pipeline_mode = #tpu.pipeline_mode<synchronous>, transform_indices = @transform_2, window_bounds = array<i64: 32, 128>}, {pipeline_mode = #tpu.pipeline_mode<synchronous>, transform_indices = @transform_3, window_bounds = array<i64: 32, 128>}, {pipeline_mode = #tpu.pipeline_mode<synchronous>, transform_indices = @transform_4, window_bounds = array<i64: 128, 128>}, {pipeline_mode = #tpu.pipeline_mode<synchronous>, transform_indices = @transform_5, window_bounds = array<i64: 128, 128>}, {pipeline_mode = #tpu.pipeline_mode<synchronous>, transform_indices = @transform_6, window_bounds = array<i64: 128, 128>}, {pipeline_mode = #tpu.pipeline_mode<synchronous>, transform_indices = @transform_7, window_bounds = array<i64: 128, 128>}, {pipeline_mode = #tpu.pipeline_mode<synchronous>, transform_indices = @transform_8, window_bounds = array<i64: 128, 128>}, {pipeline_mode = #tpu.pipeline_mode<synchronous>, transform_indices = @transform_9, window_bounds = array<i64: 1, 128>}, {pipeline_mode = #tpu.pipeline_mode<synchronous>, transform_indices = @transform_10, window_bounds = array<i64: 1, 128>}, {pipeline_mode = #tpu.pipeline_mode<synchronous>, transform_indices = @transform_11, window_bounds = array<i64: 128, 512>}, {pipeline_mode = #tpu.pipeline_mode<synchronous>, transform_indices = @transform_12, window_bounds = array<i64: 1, 512>}, {pipeline_mode = #tpu.pipeline_mode<synchronous>, transform_indices = @transform_13, window_bounds = array<i64: 512, 128>}, {pipeline_mode = #tpu.pipeline_mode<synchronous>, transform_indices = @transform_14, window_bounds = array<i64: 1, 128>}, {pipeline_mode = #tpu.pipeline_mode<synchronous>, transform_indices = @transform_15, window_bounds = array<i64: 1, 128>}, {pipeline_mode = #tpu.pipeline_mode<synchronous>, transform_indices = @transform_16, window_bounds = array<i64: 1, 128>}, {pipeline_mode = #tpu.pipeline_mode<synchronous>, transform_indices = @transform_17, window_bounds = array<i64: 32, 128>}]} {
    %c0 = arith.constant 0 : index
    %c0_0 = arith.constant 0 : index
    %0 = vector.load %arg1[%c0, %c0_0] : memref<32x128xf32, #tpu.memory_space<vmem>>, vector<32x128xf32>
    %1 = arith.truncf %0 : vector<32x128xf32> to vector<32x128xbf16>
    %c0_1 = arith.constant 0 : index
    %c0_2 = arith.constant 0 : index
    %2 = vector.load %arg6[%c0_1, %c0_2] : memref<128x128xbf16, #tpu.memory_space<vmem>>, vector<128x128xbf16>
    %cst = arith.constant dense<0.000000e+00> : vector<32x128xf32>
    %3 = tpu.matmul %1, %2, %cst {dimension_numbers = #tpu.dot_dimension_numbers<[1], [0], [0], [1], [0, 0, 1, 1], [], []>} : vector<32x128xbf16>, vector<128x128xbf16>, vector<32x128xf32> -> vector<32x128xf32>
    %c0_3 = arith.constant 0 : index
    %c0_4 = arith.constant 0 : index
    %4 = vector.load %arg2[%c0_3, %c0_4] : memref<32x128xf32, #tpu.memory_space<vmem>>, vector<32x128xf32>
    %5 = arith.truncf %4 : vector<32x128xf32> to vector<32x128xbf16>
    %c0_5 = arith.constant 0 : index
    %c0_6 = arith.constant 0 : index
    %6 = vector.load %arg7[%c0_5, %c0_6] : memref<128x128xbf16, #tpu.memory_space<vmem>>, vector<128x128xbf16>
    %cst_7 = arith.constant dense<0.000000e+00> : vector<32x128xf32>
    %7 = tpu.matmul %5, %6, %cst_7 {dimension_numbers = #tpu.dot_dimension_numbers<[1], [0], [0], [1], [0, 0, 1, 1], [], []>} : vector<32x128xbf16>, vector<128x128xbf16>, vector<32x128xf32> -> vector<32x128xf32>
    %c0_8 = arith.constant 0 : index
    %c0_9 = arith.constant 0 : index
    %8 = vector.load %arg3[%c0_8, %c0_9] : memref<32x128xf32, #tpu.memory_space<vmem>>, vector<32x128xf32>
    %9 = arith.truncf %8 : vector<32x128xf32> to vector<32x128xbf16>
    %c0_10 = arith.constant 0 : index
    %c0_11 = arith.constant 0 : index
    %10 = vector.load %arg8[%c0_10, %c0_11] : memref<128x128xbf16, #tpu.memory_space<vmem>>, vector<128x128xbf16>
    %cst_12 = arith.constant dense<0.000000e+00> : vector<32x128xf32>
    %11 = tpu.matmul %9, %10, %cst_12 {dimension_numbers = #tpu.dot_dimension_numbers<[1], [0], [0], [1], [0, 0, 1, 1], [], []>} : vector<32x128xbf16>, vector<128x128xbf16>, vector<32x128xf32> -> vector<32x128xf32>
    %c0_13 = arith.constant 0 : index
    %c0_14 = arith.constant 0 : index
    %12 = vector.load %arg5[%c0_13, %c0_14] : memref<128x128xf32, #tpu.memory_space<vmem>>, vector<128x128xf32>
    %13 = tpu.concatenate %7, %7, %7, %7 in 0 : vector<32x128xf32>, vector<32x128xf32>, vector<32x128xf32>, vector<32x128xf32> -> vector<128x128xf32>
    %14 = arith.mulf %13, %12 : vector<128x128xf32>
    %15 = arith.truncf %14 : vector<128x128xf32> to vector<128x128xbf16>
    %16 = tpu.concatenate %11, %11, %11, %11 in 0 : vector<32x128xf32>, vector<32x128xf32>, vector<32x128xf32>, vector<32x128xf32> -> vector<128x128xf32>
    %17 = arith.mulf %16, %12 : vector<128x128xf32>
    %18 = arith.truncf %17 : vector<128x128xf32> to vector<128x128xbf16>
    %19 = arith.truncf %3 : vector<32x128xf32> to vector<32x128xbf16>
    %cst_15 = arith.constant dense<0.000000e+00> : vector<32x128xf32>
    %20 = tpu.matmul %19, %15, %cst_15 {dimension_numbers = #tpu.dot_dimension_numbers<[1], [1], [0], [0], [0, 0, 1, 0], [], []>} : vector<32x128xbf16>, vector<128x128xbf16>, vector<32x128xf32> -> vector<32x128xf32>
    %c0_16 = arith.constant 0 : index
    %c0_17 = arith.constant 0 : index
    %21 = vector.load %arg4[%c0_16, %c0_17] : memref<32x128xf32, #tpu.memory_space<vmem>>, vector<32x128xf32>
    %22 = arith.addf %20, %21 : vector<32x128xf32>
    %cst_18 = arith.constant dense<0xFF800000> : vector<32xf32>
    %23 = vector.multi_reduction <maximumf>, %22, %cst_18 [1] : vector<32x128xf32> to vector<32xf32>
    %24 = vector.shape_cast %23 : vector<32xf32> to vector<32x1xf32>
    %25 = vector.broadcast %24 : vector<32x1xf32> to vector<32x128xf32>
    %26 = arith.subf %22, %25 : vector<32x128xf32>
    %27 = math.exp %26 : vector<32x128xf32>
    %28 = arith.truncf %27 : vector<32x128xf32> to vector<32x128xbf16>
    %cst_19 = arith.constant dense<0.000000e+00> : vector<32x128xf32>
    %29 = tpu.matmul %28, %18, %cst_19 {dimension_numbers = #tpu.dot_dimension_numbers<[1], [0], [0], [1], [0, 0, 1, 1], [], []>} : vector<32x128xbf16>, vector<128x128xbf16>, vector<32x128xf32> -> vector<32x128xf32>
    %30 = arith.truncf %12 : vector<128x128xf32> to vector<128x128xbf16>
    %cst_20 = arith.constant dense<0.000000e+00> : vector<32x128xf32>
    %31 = tpu.matmul %28, %30, %cst_20 {dimension_numbers = #tpu.dot_dimension_numbers<[1], [0], [0], [1], [0, 0, 1, 1], [], []>} : vector<32x128xbf16>, vector<128x128xbf16>, vector<32x128xf32> -> vector<32x128xf32>
    %cst_21 = arith.constant 1.000000e-30 : f32
    %32 = vector.broadcast %cst_21 : f32 to vector<32x128xf32>
    %33 = arith.maximumf %31, %32 : vector<32x128xf32>
    %34 = tpu.reciprocal %33 {approx = true} : vector<32x128xf32> -> vector<32x128xf32>
    %35 = arith.mulf %29, %34 : vector<32x128xf32>
    %36 = arith.truncf %35 : vector<32x128xf32> to vector<32x128xbf16>
    %c0_22 = arith.constant 0 : index
    %c0_23 = arith.constant 0 : index
    %37 = vector.load %arg9[%c0_22, %c0_23] : memref<128x128xbf16, #tpu.memory_space<vmem>>, vector<128x128xbf16>
    %cst_24 = arith.constant dense<0.000000e+00> : vector<32x128xf32>
    %38 = tpu.matmul %36, %37, %cst_24 {dimension_numbers = #tpu.dot_dimension_numbers<[1], [0], [0], [1], [0, 0, 1, 1], [], []>} : vector<32x128xbf16>, vector<128x128xbf16>, vector<32x128xf32> -> vector<32x128xf32>
    %39 = arith.addf %38, %0 : vector<32x128xf32>
    %c0_25 = arith.constant 0 : index
    %c0_26 = arith.constant 0 : index
    %40 = vector.load %arg10[%c0_25, %c0_26] : memref<1x128xf32, #tpu.memory_space<vmem>>, vector<1x128xf32>
    %c0_27 = arith.constant 0 : index
    %c0_28 = arith.constant 0 : index
    %41 = vector.load %arg11[%c0_27, %c0_28] : memref<1x128xf32, #tpu.memory_space<vmem>>, vector<1x128xf32>
    %cst_29 = arith.constant dense<0.000000e+00> : vector<32xf32>
    %42 = vector.multi_reduction <add>, %39, %cst_29 [1] : vector<32x128xf32> to vector<32xf32>
    %43 = vector.shape_cast %42 : vector<32xf32> to vector<32x1xf32>
    %cst_30 = arith.constant 1.280000e+02 : f32
    %44 = vector.broadcast %cst_30 : f32 to vector<32x1xf32>
    %45 = arith.divf %43, %44 : vector<32x1xf32>
    %46 = vector.broadcast %45 : vector<32x1xf32> to vector<32x128xf32>
    %47 = arith.subf %39, %46 : vector<32x128xf32>
    %48 = arith.mulf %47, %47 : vector<32x128xf32>
    %cst_31 = arith.constant dense<0.000000e+00> : vector<32xf32>
    %49 = vector.multi_reduction <add>, %48, %cst_31 [1] : vector<32x128xf32> to vector<32xf32>
    %50 = vector.shape_cast %49 : vector<32xf32> to vector<32x1xf32>
    %cst_32 = arith.constant 1.280000e+02 : f32
    %51 = vector.broadcast %cst_32 : f32 to vector<32x1xf32>
    %52 = arith.divf %50, %51 : vector<32x1xf32>
    %53 = vector.broadcast %45 : vector<32x1xf32> to vector<32x128xf32>
    %54 = arith.subf %39, %53 : vector<32x128xf32>
    %cst_33 = arith.constant 9.99999974E-6 : f32
    %55 = vector.broadcast %cst_33 : f32 to vector<32x1xf32>
    %56 = arith.addf %52, %55 : vector<32x1xf32>
    %57 = math.rsqrt %56 : vector<32x1xf32>
    %58 = vector.broadcast %57 : vector<32x1xf32> to vector<32x128xf32>
    %59 = arith.mulf %54, %58 : vector<32x128xf32>
    %60 = vector.broadcast %40 : vector<1x128xf32> to vector<32x128xf32>
    %61 = arith.mulf %59, %60 : vector<32x128xf32>
    %62 = vector.broadcast %41 : vector<1x128xf32> to vector<32x128xf32>
    %63 = arith.addf %61, %62 : vector<32x128xf32>
    %64 = arith.truncf %63 : vector<32x128xf32> to vector<32x128xbf16>
    %c0_34 = arith.constant 0 : index
    %c0_35 = arith.constant 0 : index
    %65 = vector.load %arg12[%c0_34, %c0_35] : memref<128x512xbf16, #tpu.memory_space<vmem>>, vector<128x512xbf16>
    %cst_36 = arith.constant dense<0.000000e+00> : vector<32x512xf32>
    %66 = tpu.matmul %64, %65, %cst_36 {dimension_numbers = #tpu.dot_dimension_numbers<[1], [0], [0], [1], [0, 0, 1, 1], [], []>} : vector<32x128xbf16>, vector<128x512xbf16>, vector<32x512xf32> -> vector<32x512xf32>
    %c0_37 = arith.constant 0 : index
    %c0_38 = arith.constant 0 : index
    %67 = vector.load %arg13[%c0_37, %c0_38] : memref<1x512xf32, #tpu.memory_space<vmem>>, vector<1x512xf32>
    %68 = vector.broadcast %67 : vector<1x512xf32> to vector<32x512xf32>
    %69 = arith.addf %66, %68 : vector<32x512xf32>
    %cst_39 = arith.constant 0.000000e+00 : f32
    %70 = vector.broadcast %cst_39 : f32 to vector<32x512xf32>
    %71 = arith.maximumf %69, %70 : vector<32x512xf32>
    %72 = arith.truncf %71 : vector<32x512xf32> to vector<32x512xbf16>
    %c0_40 = arith.constant 0 : index
    %c0_41 = arith.constant 0 : index
    %73 = vector.load %arg14[%c0_40, %c0_41] : memref<512x128xbf16, #tpu.memory_space<vmem>>, vector<512x128xbf16>
    %cst_42 = arith.constant dense<0.000000e+00> : vector<32x128xf32>
    %74 = tpu.matmul %72, %73, %cst_42 {dimension_numbers = #tpu.dot_dimension_numbers<[1], [0], [0], [1], [0, 0, 1, 1], [], []>} : vector<32x512xbf16>, vector<512x128xbf16>, vector<32x128xf32> -> vector<32x128xf32>
    %c0_43 = arith.constant 0 : index
    %c0_44 = arith.constant 0 : index
    %75 = vector.load %arg15[%c0_43, %c0_44] : memref<1x128xf32, #tpu.memory_space<vmem>>, vector<1x128xf32>
    %76 = vector.broadcast %75 : vector<1x128xf32> to vector<32x128xf32>
    %77 = arith.addf %74, %76 : vector<32x128xf32>
    %78 = arith.addf %63, %77 : vector<32x128xf32>
    %c0_45 = arith.constant 0 : index
    %c0_46 = arith.constant 0 : index
    %79 = vector.load %arg16[%c0_45, %c0_46] : memref<1x128xf32, #tpu.memory_space<vmem>>, vector<1x128xf32>
    %c0_47 = arith.constant 0 : index
    %c0_48 = arith.constant 0 : index
    %80 = vector.load %arg17[%c0_47, %c0_48] : memref<1x128xf32, #tpu.memory_space<vmem>>, vector<1x128xf32>
    %cst_49 = arith.constant dense<0.000000e+00> : vector<32xf32>
    %81 = vector.multi_reduction <add>, %78, %cst_49 [1] : vector<32x128xf32> to vector<32xf32>
    %82 = vector.shape_cast %81 : vector<32xf32> to vector<32x1xf32>
    %cst_50 = arith.constant 1.280000e+02 : f32
    %83 = vector.broadcast %cst_50 : f32 to vector<32x1xf32>
    %84 = arith.divf %82, %83 : vector<32x1xf32>
    %85 = vector.broadcast %84 : vector<32x1xf32> to vector<32x128xf32>
    %86 = arith.subf %78, %85 : vector<32x128xf32>
    %87 = arith.mulf %86, %86 : vector<32x128xf32>
    %cst_51 = arith.constant dense<0.000000e+00> : vector<32xf32>
    %88 = vector.multi_reduction <add>, %87, %cst_51 [1] : vector<32x128xf32> to vector<32xf32>
    %89 = vector.shape_cast %88 : vector<32xf32> to vector<32x1xf32>
    %cst_52 = arith.constant 1.280000e+02 : f32
    %90 = vector.broadcast %cst_52 : f32 to vector<32x1xf32>
    %91 = arith.divf %89, %90 : vector<32x1xf32>
    %92 = vector.broadcast %84 : vector<32x1xf32> to vector<32x128xf32>
    %93 = arith.subf %78, %92 : vector<32x128xf32>
    %cst_53 = arith.constant 9.99999974E-6 : f32
    %94 = vector.broadcast %cst_53 : f32 to vector<32x1xf32>
    %95 = arith.addf %91, %94 : vector<32x1xf32>
    %96 = math.rsqrt %95 : vector<32x1xf32>
    %97 = vector.broadcast %96 : vector<32x1xf32> to vector<32x128xf32>
    %98 = arith.mulf %93, %97 : vector<32x128xf32>
    %99 = vector.broadcast %79 : vector<1x128xf32> to vector<32x128xf32>
    %100 = arith.mulf %98, %99 : vector<32x128xf32>
    %101 = vector.broadcast %80 : vector<1x128xf32> to vector<32x128xf32>
    %102 = arith.addf %100, %101 : vector<32x128xf32>
    %c0_54 = arith.constant 0 : index
    %c0_55 = arith.constant 0 : index
    %103 = vector.load %arg18[%c0_54, %c0_55] : memref<32x128xf32, #tpu.memory_space<vmem>>, vector<32x128xf32>
    tpu.vector_store %arg18[%c0_54, %c0_55], %102 {strides = array<i32>} : memref<32x128xf32, #tpu.memory_space<vmem>>, vector<32x128xf32>,
    return
  }
  func.func @transform_0(%arg0: i32) -> (i32, i32) {
    %c0_i32 = arith.constant 0 : i32
    %c0_i32_0 = arith.constant 0 : i32
    %c0_i32_1 = arith.constant 0 : i32
    return %c0_i32, %c0_i32_0 : i32, i32
  }
  func.func @transform_1(%arg0: i32) -> (i32, i32) {
    %c0_i32 = arith.constant 0 : i32
    %c0_i32_0 = arith.constant 0 : i32
    %c0_i32_1 = arith.constant 0 : i32
    return %c0_i32, %c0_i32_0 : i32, i32
  }
  func.func @transform_2(%arg0: i32) -> (i32, i32) {
    %c0_i32 = arith.constant 0 : i32
    %c0_i32_0 = arith.constant 0 : i32
    %c0_i32_1 = arith.constant 0 : i32
    return %c0_i32, %c0_i32_0 : i32, i32
  }
  func.func @transform_3(%arg0: i32) -> (i32, i32) {
    %c0_i32 = arith.constant 0 : i32
    %c0_i32_0 = arith.constant 0 : i32
    %c0_i32_1 = arith.constant 0 : i32
    return %c0_i32, %c0_i32_0 : i32, i32
  }
  func.func @transform_4(%arg0: i32) -> (i32, i32) {
    %c0_i32 = arith.constant 0 : i32
    %c0_i32_0 = arith.constant 0 : i32
    %c0_i32_1 = arith.constant 0 : i32
    return %c0_i32, %c0_i32_0 : i32, i32
  }
  func.func @transform_5(%arg0: i32) -> (i32, i32) {
    %c0_i32 = arith.constant 0 : i32
    %c0_i32_0 = arith.constant 0 : i32
    %c0_i32_1 = arith.constant 0 : i32
    return %c0_i32, %c0_i32_0 : i32, i32
  }
  func.func @transform_6(%arg0: i32) -> (i32, i32) {
    %c0_i32 = arith.constant 0 : i32
    %c0_i32_0 = arith.constant 0 : i32
    %c0_i32_1 = arith.constant 0 : i32
    return %c0_i32, %c0_i32_0 : i32, i32
  }
  func.func @transform_7(%arg0: i32) -> (i32, i32) {
    %c0_i32 = arith.constant 0 : i32
    %c0_i32_0 = arith.constant 0 : i32
    %c0_i32_1 = arith.constant 0 : i32
    return %c0_i32, %c0_i32_0 : i32, i32
  }
  func.func @transform_8(%arg0: i32) -> (i32, i32) {
    %c0_i32 = arith.constant 0 : i32
    %c0_i32_0 = arith.constant 0 : i32
    %c0_i32_1 = arith.constant 0 : i32
    return %c0_i32, %c0_i32_0 : i32, i32
  }
  func.func @transform_9(%arg0: i32) -> (i32, i32) {
    %c0_i32 = arith.constant 0 : i32
    %c0_i32_0 = arith.constant 0 : i32
    %c0_i32_1 = arith.constant 0 : i32
    return %c0_i32, %c0_i32_0 : i32, i32
  }
  func.func @transform_10(%arg0: i32) -> (i32, i32) {
    %c0_i32 = arith.constant 0 : i32
    %c0_i32_0 = arith.constant 0 : i32
    %c0_i32_1 = arith.constant 0 : i32
    return %c0_i32, %c0_i32_0 : i32, i32
  }
  func.func @transform_11(%arg0: i32) -> (i32, i32) {
    %c0_i32 = arith.constant 0 : i32
    %c0_i32_0 = arith.constant 0 : i32
    %c0_i32_1 = arith.constant 0 : i32
    return %c0_i32, %c0_i32_0 : i32, i32
  }
  func.func @transform_12(%arg0: i32) -> (i32, i32) {
    %c0_i32 = arith.constant 0 : i32
    %c0_i32_0 = arith.constant 0 : i32
    %c0_i32_1 = arith.constant 0 : i32
    return %c0_i32, %c0_i32_0 : i32, i32
  }
  func.func @transform_13(%arg0: i32) -> (i32, i32) {
    %c0_i32 = arith.constant 0 : i32
    %c0_i32_0 = arith.constant 0 : i32
    %c0_i32_1 = arith.constant 0 : i32
    return %c0_i32, %c0_i32_0 : i32, i32
  }
  func.func @transform_14(%arg0: i32) -> (i32, i32) {
    %c0_i32 = arith.constant 0 : i32
    %c0_i32_0 = arith.constant 0 : i32
    %c0_i32_1 = arith.constant 0 : i32
    return %c0_i32, %c0_i32_0 : i32, i32
  }
  func.func @transform_15(%arg0: i32) -> (i32, i32) {
    %c0_i32 = arith.constant 0 : i32
    %c0_i32_0 = arith.constant 0 : i32
    %c0_i32_1 = arith.constant 0 : i32
    return %c0_i32, %c0_i32_0 : i32, i32
  }
  func.func @transform_16(%arg0: i32) -> (i32, i32) {
    %c0_i32 = arith.constant 0 : i32
    %c0_i32_0 = arith.constant 0 : i32
    %c0_i32_1 = arith.constant 0 : i32
    return %c0_i32, %c0_i32_0 : i32, i32
  }
  func.func @transform_17(%arg0: i32) -> (i32, i32) {
    %c0_i32 = arith.constant 0 : i32
    %c0_i32_0 = arith.constant 0 : i32
    %c0_i32_1 = arith.constant 0 : i32
    return %c0_i32, %c0_i32_0 : i32, i32
  }
}

</mosaic_0001>

<bundles_post_ra>
// kernel: _transformer_block_impl.1
= control target key start
LH: loop header
LB: loop body
LE: loop exit
PB: predicated region body
PF: predicated region fallthrough
CT: control target
= control target key end

     0   :  { %s2775_s0 = inlined_call_operand.vmem [shape: f32[32,128], index: 0, kind: input, shape index: {}]   ;;  %s2776_s1 = inlined_call_operand.vmem [shape: f32[32,128], index: 1, kind: input, shape index: {}]   ;;  %s2777_s2 = inlined_call_operand.vmem [shape: f32[32,128], index: 2, kind: input, shape index: {}]   ;;  %s2778_s3 = inlined_call_operand.vmem [shape: f32[32,128], index: 3, kind: input, shape index: {}]   ;;  %s2779_s4 = inlined_call_operand.vmem [shape: f32[128,128], index: 4, kind: input, shape index: {}]   ;;  %s2780_s5 = inlined_call_operand.vmem [shape: bf16[128,128], index: 5, kind: input, shape index: {}]   ;;  %s2781_s6 = inlined_call_operand.vmem [shape: bf16[128,128], index: 6, kind: input, shape index: {}]   ;;  %s2782_s7 = inlined_call_operand.vmem [shape: bf16[128,128], index: 7, kind: input, shape index: {}]   ;;  %s2783_s8 = inlined_call_operand.vmem [shape: bf16[128,128], index: 8, kind: input, shape index: {}]   ;;  %s2784_s9 = inlined_call_operand.vmem [shape: f32[1,128], index: 9, kind: input, shape index: {}]   ;;  %s2785_s10 = inlined_call_operand.vmem [shape: f32[1,128], index: 10, kind: input, shape index: {}]   ;;  %s2786_s11 = inlined_call_operand.vmem [shape: bf16[128,512], index: 11, kind: input, shape index: {}]   ;;  %s2787_s12 = inlined_call_operand.vmem [shape: f32[1,512], index: 12, kind: input, shape index: {}]   ;;  %s2788_s13 = inlined_call_operand.vmem [shape: bf16[512,128], index: 13, kind: input, shape index: {}]   ;;  %s2789_s14 = inlined_call_operand.vmem [shape: f32[1,128], index: 14, kind: input, shape index: {}]   ;;  %s2790_s15 = inlined_call_operand.vmem [shape: f32[1,128], index: 15, kind: input, shape index: {}]   ;;  %s2791_s16 = inlined_call_operand.vmem [shape: f32[1,128], index: 16, kind: input, shape index: {}]   ;;  %s2792_s17 = inlined_call_operand.hbm [shape: f32[32,128], index: 17, kind: output, shape index: {}]  }
   0x1   :  { %2795 = sst [smem:[#allocation5_spill]] %s2775_s0 }
   0x2   :  { %2796 = sst [smem:[#allocation6_spill]] %s2776_s1 }
   0x3   :  { %v1842_v0 = vld [vmem:[%s2781_s6 + $0x38] sm:$0xff]  ;;  %v1841_v1 = vld [vmem:[%s2781_s6 + $0x30] sm:$0xff] }
   0x4   :  { %216 = vmatpush.bf16.msra.mxu1 %v1842_v0 }
   0x5   :  { %22 = vsyncpa [#allocation3], 0  ;;  %v1840_v2 = vld [vmem:[%s2781_s6 + $0x28] sm:$0xff]  ;;  %v1839_v3 = vld [vmem:[%s2781_s6 + $0x20] sm:$0xff]  ;;  %s2797_s19 = sld [smem:[#allocation6_spill]]  ;;  %s1431_s28 = sshll.u32 %s2792_s17, 4  ;;  %s1432_s28 = int_to_ptr.hbm [resolvable:$true] %s1431_s28 }
   0x6   :  { %v1838_v4 = vld [vmem:[%s2781_s6 + $0x18] sm:$0xff]  ;;  %v1837_v6 = vld [vmem:[%s2781_s6 + $0x10] sm:$0xff]  ;;  %v1836_v8 = vld [vmem:[%s2781_s6 + $0x8] sm:$0xff]  ;;  %s2798_s22 = sld [smem:[#allocation5_spill]]  ;;  %s1994_s29 = smov 128  }
   0x7   :  { %v1834_v5 = vld [vmem:[%s2780_s5 + $0x38] sm:$0xff]  ;;  %v1833_v7 = vld [vmem:[%s2780_s5 + $0x30] sm:$0xff]  ;;  %v1832_v9 = vld [vmem:[%s2780_s5 + $0x28] sm:$0xff]  ;;  %s1995_s0 = smov 8  }
   0x8   :  { %217 = vmatpush.bf16.msra.mxu1 %v1841_v1  ;;  %127 = vmatpush.bf16.msra.mxu0 %v1834_v5  ;;  %v1835_v10 = vld [vmem:[%s2781_s6] sm:$0xff]  ;;  %v1830_v15 = vld [vmem:[%s2780_s5 + $0x18] sm:$0xff]  ;;  %v1829_v16 = vld [vmem:[%s2780_s5 + $0x10] sm:$0xff] }
   0x9   :  { %v1831_v13 = vld [vmem:[%s2780_s5 + $0x20] sm:$0xff]  ;;  %v1828_v17 = vld [vmem:[%s2780_s5 + $0x8] sm:$0xff]  ;;  %v2185_v36 = vld [vmem:[%s2779_s4 + $0x70] sm:$0xff] }
   0xa   :  { %v1827_v20 = vld [vmem:[%s2780_s5] sm:$0xff]  ;;  %v2178_v30 = vld [vmem:[%s2779_s4 + $0x8] sm:$0xff]  ;;  %v2190_v37 = vld [vmem:[%s2779_s4 + $0x78] sm:$0xff] }
   0xb   :  { %v146_v11 = vld [vmem:[%s2797_s19] sm:$0xff]  ;;  %v147_v12 = vld [vmem:[%s2797_s19 + $0x8] sm:$0xff]  ;;  %v148_v18 = vld [vmem:[%s2797_s19 + $0x10] sm:$0xff] }
   0xc   :  { %218 = vmatpush.bf16.msra.mxu1 %v1840_v2  ;;  %128 = vmatpush.bf16.msra.mxu0 %v1833_v7  ;;  %v150_v14 = vpack.c.bf16 %v147_v12, %v146_v11  ;;  %v149_v19 = vld [vmem:[%s2797_s19 + $0x18] sm:$0xff]  ;;  %v2149_v21 = vld [vmem:[%s2798_s22] sm:$0xff]  ;;  %v2154_v22 = vld [vmem:[%s2798_s22 + $0x8] sm:$0xff] }
   0xd   :  { %v151_v23 = vpack.c.bf16 %v149_v19, %v148_v18  ;;  %v61_v24 = vpack.c.bf16 %v2154_v22, %v2149_v21  ;;  %v2161_v25 = vld [vmem:[%s2798_s22 + $0x10] sm:$0xff]  ;;  %v2166_v26 = vld [vmem:[%s2798_s22 + $0x18] sm:$0xff]  ;;  %v2173_v29 = vld [vmem:[%s2779_s4] sm:$0xff] }
   0xe   :  { %v62_v27 = vpack.c.bf16 %v2166_v26, %v2161_v25  ;;  %v2197_v42 = vld [vmem:[%s2779_s4 + $0x68] sm:$0xff]  ;;  %v2202_v43 = vld [vmem:[%s2779_s4 + $0x60] sm:$0xff]  ;;  %v2209_v47 = vld [vmem:[%s2779_s4 + $0x58] sm:$0xff] }
   0xf   :  { %v2214_v48 = vld [vmem:[%s2779_s4 + $0x50] sm:$0xff]  ;;  %v2221_v52 = vld [vmem:[%s2779_s4 + $0x48] sm:$0xff]  ;;  %v2226_v53 = vld [vmem:[%s2779_s4 + $0x40] sm:$0xff] }
  0x10   :  { %219 = vmatpush.bf16.msra.mxu1 %v1839_v3  ;;  %129 = vmatpush.bf16.msra.mxu0 %v1832_v9  ;;  %v2233_v57 = vld [vmem:[%s2779_s4 + $0x38] sm:$0xff]  ;;  %v2238_v58 = vld [vmem:[%s2779_s4 + $0x30] sm:$0xff]  ;;  %v2245_v62 = vld [vmem:[%s2779_s4 + $0x28] sm:$0xff] }
  0x11   :  { %v1850_v63 = vld [vmem:[%s2782_s7 + $0x38] sm:$0xff]  ;;  %v2253_v0 = vld [vmem:[%s2779_s4 + $0x20] sm:$0xff]  ;;  %v1849_v1 = vld [vmem:[%s2782_s7 + $0x30] sm:$0xff] }
  0x12   :  { %305 = vmatpush.bf16.msra.mxu2 %v1850_v63  ;;  %v2271_v7 = vld [vmem:[%s2779_s4 + $0x10] sm:$0xff]  ;;  %v1847_v12 = vld [vmem:[%s2782_s7 + $0x20] sm:$0xff] }
  0x13   :  { %v1843_v18 = vld [vmem:[%s2782_s7] sm:$0xff] }
  0x14   :  { %220 = vmatpush.bf16.msra.mxu1 %v1838_v4  ;;  %130 = vmatpush.bf16.msra.mxu0 %v1831_v13  ;;  %v1848_v4 = vld [vmem:[%s2782_s7 + $0x28] sm:$0xff]  ;;  %v1846_v13 = vld [vmem:[%s2782_s7 + $0x18] sm:$0xff]  ;;  %v235_v19 = vld [vmem:[%s2777_s2] sm:$0xff] }
  0x16   :  { %306 = vmatpush.bf16.msra.mxu2 %v1849_v1 }
  0x18   :  { %221 = vmatpush.bf16.msra.mxu1 %v1837_v6  ;;  %131 = vmatpush.bf16.msra.mxu0 %v1830_v15  ;;  %v2266_v6 = vld [vmem:[%s2779_s4 + $0x18] sm:$0xff] }
  0x1a   :  { %307 = vmatpush.bf16.msra.mxu2 %v1848_v4  ;;  %v460_v4 = vpack.c.bf16 %v2197_v42, %v2202_v43 }
  0x1c   :  { %222 = vmatpush.bf16.msra.mxu1 %v1836_v8  ;;  %132 = vmatpush.bf16.msra.mxu0 %v1829_v16  ;;  %v1844_v16 = vld [vmem:[%s2782_s7 + $0x8] sm:$0xff] }
  0x1e   :  { %308 = vmatpush.bf16.msra.mxu2 %v1847_v12 }
  0x20   :  { %223 = vmatpush.bf16.msra.mxu1 %v1835_v10  ;;  %133 = vmatpush.bf16.msra.mxu0 %v1828_v17 }
  0x22   :  { %309 = vmatpush.bf16.msra.mxu2 %v1846_v13 }
  0x23   :  { %224 = vmatmul.bf16.vlgmr.msra.gmra.mxu1 %v150_v14  ;;  %v1845_v14 = vld [vmem:[%s2782_s7 + $0x10] sm:$0xff] }
  0x24   :  { %134 = vmatpush.bf16.msra.mxu0 %v1827_v20  ;;  %v236_v20 = vld [vmem:[%s2777_s2 + $0x8] sm:$0xff] }
  0x26   :  { %310 = vmatpush.bf16.msra.mxu2 %v1845_v14 }
  0x27   :  { %135 = vmatmul.bf16.vlgmr.msra.gmra.mxu0 %v61_v24  ;;  %v239_v24 = vpack.c.bf16 %v236_v20, %v235_v19 }
  0x2a   :  { %311 = vmatpush.bf16.msra.mxu2 %v1844_v16 }
  0x2e   :  { %312 = vmatpush.bf16.msra.mxu2 %v1843_v18 }
  0x31   :  { %313 = vmatmul.bf16.vlgmr.msra.gmra.mxu2 %v239_v24  ;;  %v457_v24 = vpack.c.bf16 %v2233_v57, %v2238_v58 }
  0x33   :  { %229 = vmatmul.bf16.gmra.mxu1 %v151_v23 }
  0x37   :  { %140 = vmatmul.bf16.gmra.mxu0 %v62_v27 }
  0xa0   :  { %v225_v28 = vpop.f32.mrf.mxu1 }
  0xa1   :  { %v340_v32 = vmul.f32 %v2173_v29, %v225_v28  ;;  %v352_v45 = vmul.f32 %v2202_v43, %v225_v28  ;;  %v348_v55 = vmul.f32 %v2226_v53, %v225_v28  ;;  %v344_v3 = vmul.f32 %v2253_v0, %v225_v28 }
  0xa4   :  { %v136_v9 = vpop.f32.mrf.mxu0 }
  0xa8   :  { %v227_v31 = vpop.f32.mrf.mxu1 }
  0xa9   :  { %v341_v33 = vmul.f32 %v2178_v30, %v227_v31  ;;  %v353_v44 = vmul.f32 %v2197_v42, %v227_v31  ;;  %v349_v54 = vmul.f32 %v2221_v52, %v227_v31  ;;  %v345_v2 = vmul.f32 %v2245_v62, %v227_v31  ;;  %v237_v31 = vld [vmem:[%s2777_s2 + $0x10] sm:$0xff] }
  0xab   :  { %v356_v34 = vpack.c.bf16 %v341_v33, %v340_v32  ;;  %v362_v46 = vpack.c.bf16 %v353_v44, %v352_v45  ;;  %v360_v56 = vpack.c.bf16 %v349_v54, %v348_v55  ;;  %v358_v5 = vpack.c.bf16 %v345_v2, %v344_v3  ;;  %v238_v32 = vld [vmem:[%s2777_s2 + $0x18] sm:$0xff] }
  0xac   :  { %v138_v15 = vpop.f32.mrf.mxu0  ;;  %v240_v33 = vpack.c.bf16 %v238_v32, %v237_v31  ;;  %v393_v54 = vld [vmem:[%s2778_s3 + $0x18] sm:$0xff]  ;;  %v461_v2 = vpack.c.bf16 %v2190_v37, %v2185_v36  ;;  %v454_v31 = vpack.c.bf16 %v2178_v30, %v2173_v29 }
  0xad   :  { %v388_v17 = vpack.c.bf16 %v138_v15, %v136_v9 }
  0xae   :  { %318 = vmatmul.bf16.gmra.mxu2 %v240_v33  ;;  %462 = vmatpush.bf16.msrb.mxu1 %v461_v2 }
  0xb0   :  { %v230_v35 = vpop.f32.mrf.mxu1 }
  0xb1   :  { %v354_v39 = vmul.f32 %v2185_v36, %v230_v35  ;;  %v350_v50 = vmul.f32 %v2214_v48, %v230_v35  ;;  %v346_v60 = vmul.f32 %v2238_v58, %v230_v35  ;;  %v342_v10 = vmul.f32 %v2271_v7, %v230_v35 }
  0xb2   :  { %463 = vmatpush.bf16.msrb.mxu1 %v460_v4 }
  0xb4   :  { %v141_v23 = vpop.f32.mrf.mxu0 }
  0xb8   :  { %v232_v38 = vpop.f32.mrf.mxu1 }
  0xb9   :  { %v355_v40 = vmul.f32 %v2190_v37, %v232_v38  ;;  %v351_v49 = vmul.f32 %v2209_v47, %v232_v38  ;;  %v347_v59 = vmul.f32 %v2233_v57, %v232_v38  ;;  %v343_v8 = vmul.f32 %v2266_v6, %v232_v38 }
  0xbb   :  { %v363_v41 = vpack.c.bf16 %v355_v40, %v354_v39  ;;  %v361_v51 = vpack.c.bf16 %v351_v49, %v350_v50  ;;  %v359_v61 = vpack.c.bf16 %v347_v59, %v346_v60  ;;  %v357_v11 = vpack.c.bf16 %v343_v8, %v342_v10  ;;  %v314_v39 = vpop.f32.mrf.mxu2  ;;  %v391_v40 = vld [vmem:[%s2778_s3 + $0x8] sm:$0xff] }
  0xbc   :  { %v143_v27 = vpop.f32.mrf.mxu0  ;;  %v376_v63 = vmul.f32 %v2202_v43, %v314_v39  ;;  %v459_v10 = vpack.c.bf16 %v2209_v47, %v2214_v48  ;;  %v372_v12 = vmul.f32 %v2226_v53, %v314_v39  ;;  %v368_v14 = vmul.f32 %v2253_v0, %v314_v39 }
  0xbd   :  { %394 = vmatpush.bf16.xpose.msra.mxu3 %v363_v41  ;;  %v389_v28 = vpack.c.bf16 %v143_v27, %v141_v23  ;;  %v364_v18 = vmul.f32 %v2173_v29, %v314_v39  ;;  %v458_v23 = vpack.c.bf16 %v2221_v52, %v2226_v53  ;;  %v456_v27 = vpack.c.bf16 %v2245_v62, %v2253_v0  ;;  %v1858_v53 = vld [vmem:[%s2783_s8 + $0x38] sm:$0xff]  ;;  %v1856_v29 = vld [vmem:[%s2783_s8 + $0x28] sm:$0xff] }
  0xbe   :  { %464 = vmatpush.bf16.msrb.mxu1 %v459_v10  ;;  %559 = vmatpush.bf16.msrb.mxu2 %v1858_v53 }
  0xc2   :  { %465 = vmatpush.bf16.msrb.mxu1 %v458_v23 }
  0xc3   :  { %v316_v45 = vpop.f32.mrf.mxu2 }
  0xc4   :  { %v377_v1 = vmul.f32 %v2197_v42, %v316_v45  ;;  %v369_v15 = vmul.f32 %v2245_v62, %v316_v45  ;;  %v365_v19 = vmul.f32 %v2178_v30, %v316_v45  ;;  %v1857_v62 = vld [vmem:[%s2783_s8 + $0x30] sm:$0xff] }
  0xc5   :  { %395 = vmatpush.bf16.xpose.msra.mxu3 %v362_v46  ;;  %v392_v46 = vld [vmem:[%s2778_s3 + $0x10] sm:$0xff]  ;;  %560 = vmatpush.bf16.msrb.mxu2 %v1857_v62 }
  0xc6   :  { %v380_v20 = vpack.c.bf16 %v365_v19, %v364_v18  ;;  %466 = vmatpush.bf16.msrb.mxu1 %v457_v24  ;;  %v1992_v24 = vmov 128.0  }
  0xc9   :  { %561 = vmatpush.bf16.msrb.mxu2 %v1856_v29 }
  0xca   :  { %467 = vmatpush.bf16.msrb.mxu1 %v456_v27 }
  0xcd   :  { %396 = vmatpush.bf16.xpose.msra.mxu3 %v361_v51 }
  0xd5   :  { %397 = vmatpush.bf16.xpose.msra.mxu3 %v360_v56 }
  0xdd   :  { %398 = vmatpush.bf16.xpose.msra.mxu3 %v359_v61 }
  0xe5   :  { %399 = vmatpush.bf16.xpose.msra.mxu3 %v358_v5  ;;  %v386_v5 = vpack.c.bf16 %v377_v1, %v376_v63 }
  0xed   :  { %400 = vmatpush.bf16.xpose.msra.mxu3 %v357_v11 }
  0xf5   :  { %401 = vmatpush.bf16.xpose.msra.mxu3 %v356_v34  ;;  %v390_v34 = vld [vmem:[%s2778_s3] sm:$0xff] }
  0xfc   :  { %402 = vmatmul.bf16.vlgmr.msra.gmra.mxu3 %v388_v17 }
 0x10c   :  { %407 = vmatmul.bf16.gmra.mxu3 %v389_v28  ;;  %v455_v28 = vpack.c.bf16 %v2266_v6, %v2271_v7 }
 0x10e   :  { %468 = vmatpush.bf16.msrb.mxu1 %v455_v28 }
 0x112   :  { %469 = vmatpush.bf16.msrb.mxu1 %v454_v31 }
 0x131   :  { %v319_v51 = vpop.f32.mrf.mxu2 }
 0x132   :  { %v378_v59 = vmul.f32 %v2185_v36, %v319_v51  ;;  %v374_v8 = vmul.f32 %v2214_v48, %v319_v51  ;;  %v373_v36 = vmul.f32 %v2221_v52, %v316_v45  ;;  %v370_v42 = vmul.f32 %v2238_v58, %v319_v51 }
 0x133   :  { %v366_v48 = vmul.f32 %v2271_v7, %v319_v51  ;;  %v1853_v51 = vld [vmem:[%s2783_s8 + $0x10] sm:$0xff] }
 0x139   :  { %v321_v60 = vpop.f32.mrf.mxu2 }
 0x13a   :  { %v379_v61 = vmul.f32 %v2190_v37, %v321_v60  ;;  %v375_v9 = vmul.f32 %v2209_v47, %v321_v60  ;;  %v384_v37 = vpack.c.bf16 %v373_v36, %v372_v12  ;;  %v371_v43 = vmul.f32 %v2233_v57, %v321_v60 }
 0x13b   :  { %v382_v47 = vpack.c.bf16 %v369_v15, %v368_v14  ;;  %v367_v16 = vmul.f32 %v2266_v6, %v321_v60 }
 0x13c   :  { %v387_v3 = vpack.c.bf16 %v379_v61, %v378_v59  ;;  %v385_v11 = vpack.c.bf16 %v375_v9, %v374_v8  ;;  %v383_v13 = vpack.c.bf16 %v371_v43, %v370_v42 }
 0x13d   :  { %v381_v17 = vpack.c.bf16 %v367_v16, %v366_v48 }
 0x13e   :  { %435 = vmatpush.bf16.msrb.mxu0 %v387_v3 }
 0x142   :  { %436 = vmatpush.bf16.msrb.mxu0 %v386_v5 }
 0x146   :  { %437 = vmatpush.bf16.msrb.mxu0 %v385_v11 }
 0x14a   :  { %438 = vmatpush.bf16.msrb.mxu0 %v384_v37 }
 0x14e   :  { %439 = vmatpush.bf16.msrb.mxu0 %v383_v13 }
 0x152   :  { %440 = vmatpush.bf16.msrb.mxu0 %v382_v47 }
 0x156   :  { %441 = vmatpush.bf16.msrb.mxu0 %v381_v17 }
 0x15a   :  { %442 = vmatpush.bf16.msrb.mxu0 %v380_v20 }
 0x17f   :  { %v403_v35 = vpop.f32.mrf.mxu3 }
 0x180   :  { %v2305_v38 = vadd.f32 %v403_v35, %v390_v34 }
 0x182   :  { %413 = vmax.xlane.f32.xlu0 %v2305_v38 }
 0x187   :  { %v405_v41 = vpop.f32.mrf.mxu3 }
 0x188   :  { %v2311_v44 = vadd.f32 %v405_v41, %v391_v40 }
 0x18a   :  { %415 = vmax.xlane.f32.xlu0 %v2311_v44 }
 0x18f   :  { %v408_v49 = vpop.f32.mrf.mxu3 }
 0x190   :  { %v2317_v50 = vadd.f32 %v408_v49, %v392_v46  ;;  %v1855_v49 = vld [vmem:[%s2783_s8 + $0x20] sm:$0xff] }
 0x191   :  { %562 = vmatpush.bf16.msrb.mxu2 %v1855_v49  ;;  %v1687_v49 = vld [vmem:[%s2786_s11 + $0xf0] sm:$0xf0] }
 0x192   :  { %417 = vmax.xlane.f32.xlu1 %v2317_v50 }
 0x197   :  { %v410_v55 = vpop.f32.mrf.mxu3 }
 0x198   :  { %v2323_v56 = vadd.f32 %v410_v55, %v393_v54  ;;  %v1852_v54 = vld [vmem:[%s2783_s8 + $0x8] sm:$0xff]  ;;  %v1851_v55 = vld [vmem:[%s2783_s8] sm:$0xff] }
 0x19a   :  { %419 = vmax.xlane.f32.xlu1 %v2323_v56 }
 0x1f5   :  { %v414_v32 = vpop.xlane.xlu0 %413 }
 0x1f6   :  { %v421_v52 = vsub.f32 %v2305_v38, %v414_v32 }
 0x1f8   :  { %v425_v57 = vmul.f32 1.442695, %v421_v52 }
 0x1fa   :  { %1932 = vpow2.f32 %v425_v57 }
 0x1fd   :  { %v416_v58 = vpop.xlane.xlu0 %415 }
 0x1fe   :  { %v422_v0 = vsub.f32 %v2311_v44, %v416_v58 }
 0x200   :  { %v427_v6 = vmul.f32 1.442695, %v422_v0  ;;  %v1933_v7 = vpop.eup %1932 }
 0x202   :  { %1934 = vpow2.f32 %v427_v6 }
 0x205   :  { %v418_v30 = vpop.xlane.xlu1 %417 }
 0x206   :  { %v423_v34 = vsub.f32 %v2317_v50, %v418_v30  ;;  %v1854_v50 = vld [vmem:[%s2783_s8 + $0x18] sm:$0xff] }
 0x207   :  { %563 = vmatpush.bf16.msrb.mxu2 %v1854_v50 }
 0x208   :  { %v1935_v33 = vpop.eup %1934  ;;  %v429_v38 = vmul.f32 1.442695, %v423_v34 }
 0x209   :  { %v433_v35 = vpack.c.bf16 %v1935_v33, %v1933_v7 }
 0x20a   :  { %1936 = vpow2.f32 %v429_v38 }
 0x20b   :  { %443 = vmatmul.bf16.vlgmr.msrb.gmra.mxu0 %v433_v35  ;;  %470 = vmatmul.bf16.vlgmr.msrb.gmra.mxu1 %v433_v35 }
 0x20c   :  { %564 = vmatpush.bf16.msrb.mxu2 %v1853_v51 }
 0x20d   :  { %v420_v39 = vpop.xlane.xlu1 %419 }
 0x20e   :  { %v424_v40 = vsub.f32 %v2323_v56, %v420_v39  ;;  %v1693_v39 = vld [vmem:[%s2786_s11 + $0xe8] sm:$0xf] }
 0x210   :  { %v431_v41 = vmul.f32 1.442695, %v424_v40  ;;  %v1937_v44 = vpop.eup %1936  ;;  %565 = vmatpush.bf16.msrb.mxu2 %v1852_v54  ;;  %v1890_v40 = vld [vmem:[%s2786_s11 + $0xf4] sm:$0xf0]  ;;  %v1888_v54 = vld [vmem:[%s2786_s11 + $0xec] sm:$0xf] }
 0x212   :  { %1938 = vpow2.f32 %v431_v41  ;;  %v1685_v41 = vld [vmem:[%s2786_s11 + $0xe0] sm:$0xf] }
 0x214   :  { %566 = vmatpush.bf16.msrb.mxu2 %v1851_v55  ;;  %v1695_v55 = vld [vmem:[%s2786_s11 + $0xf8] sm:$0xf0] }
 0x218   :  { %v1939_v45 = vpop.eup %1938 }
 0x219   :  { %v434_v46 = vpack.c.bf16 %v1939_v45, %v1937_v44  ;;  %v1694_v44 = vor.u32 %v1890_v40, %v1693_v39  ;;  %v1889_v45 = vld [vmem:[%s2786_s11 + $0xec] sm:$0xf0]  ;;  %v1613_v40 = vld [vmem:[%s2786_s11 + $0x48] sm:$0xf] }
 0x21a   :  { %v1686_v50 = vor.u32 %v1889_v45, %v1685_v41  ;;  %v1870_v41 = vld [vmem:[%s2786_s11 + $0x54] sm:$0xf0] }
 0x21b   :  { %448 = vmatmul.bf16.gmra.mxu0 %v434_v46  ;;  %475 = vmatmul.bf16.gmra.mxu1 %v434_v46  ;;  %v1887_v46 = vld [vmem:[%s2786_s11 + $0xe4] sm:$0xf]  ;;  %v1614_v45 = vor.u32 %v1870_v41, %v1613_v40  ;;  %v1906_v40 = vld [vmem:[%s2788_s13 + $0x78] sm:$0xff] }
 0x21c   :  { %v1690_v51 = vor.u32 %v1887_v46, %v1687_v49  ;;  %923 = vmatpush.bf16.msra.mxu2 %v1694_v44  ;;  %885 = vmatpush.bf16.msra.mxu0 %v1686_v50  ;;  %v1605_v44 = vld [vmem:[%s2786_s11 + $0x40] sm:$0xf]  ;;  %v1869_v46 = vld [vmem:[%s2786_s11 + $0x4c] sm:$0xf0]  ;;  %v1867_v49 = vld [vmem:[%s2786_s11 + $0x44] sm:$0xf] }
 0x21d   :  { %v1607_v50 = vld [vmem:[%s2786_s11 + $0x50] sm:$0xf0] }
 0x21e   :  { %904 = vmatpush.bf16.msra.mxu1 %v1690_v51  ;;  %v1606_v51 = vor.u32 %v1869_v46, %v1605_v44  ;;  %v1914_v44 = vld [vmem:[%s2788_s13 + $0xb8] sm:$0xff] }
 0x288   :  { %v471_v56 = vpop.f32.mrf.mxu1  ;;  %v444_v59 = vpop.f32.mrf.mxu0 }
 0x289   :  { %v481_v60 = vmax.f32 %v471_v56, 1e-30  ;;  %v1698_v56 = vor.u32 %v1888_v54, %v1695_v55  ;;  %v1610_v54 = vor.u32 %v1867_v49, %v1607_v50  ;;  %v1868_v55 = vld [vmem:[%s2786_s11 + $0x4c] sm:$0xf]  ;;  %v1897_v49 = vld [vmem:[%s2788_s13 + $0x30] sm:$0xff] }
 0x28a   :  { %v1905_v50 = vld [vmem:[%s2788_s13 + $0x70] sm:$0xff] }
 0x28b   :  { %1940 = vrcp.f32 %v481_v60  ;;  %v1886_v60 = vld [vmem:[%s2786_s11 + $0xd4] sm:$0xf0]  ;;  %942 = vmatpush.bf16.msrb.mxu3 %v1698_v56  ;;  %v1615_v56 = vld [vmem:[%s2786_s11 + $0x58] sm:$0xf0] }
 0x290   :  { %v473_v61 = vpop.f32.mrf.mxu1  ;;  %v446_v1 = vpop.f32.mrf.mxu0 }
 0x291   :  { %v482_v63 = vmax.f32 %v473_v61, 1e-30  ;;  %v1941_v2 = vpop.eup %1940  ;;  %v1669_v61 = vld [vmem:[%s2786_s11 + $0xc0] sm:$0xf] }
 0x292   :  { %v489_v5 = vmul.f32 %v1941_v2, %v444_v59  ;;  %v1677_v59 = vld [vmem:[%s2786_s11 + $0xc8] sm:$0xf]  ;;  %v1883_v2 = vld [vmem:[%s2786_s11 + $0xc4] sm:$0xf] }
 0x293   :  { %1942 = vrcp.f32 %v482_v63  ;;  %v1678_v63 = vor.u32 %v1886_v60, %v1677_v59  ;;  %v1618_v59 = vor.u32 %v1868_v55, %v1615_v56  ;;  %v1597_v60 = vld [vmem:[%s2786_s11 + $0x28] sm:$0xf]  ;;  %v1927_v56 = vld [vmem:[%s2784_s9] ss:$0 sm:$0xff] }
 0x295   :  { %924 = vmatpush.bf16.msra.mxu2 %v1678_v63  ;;  %v1589_v63 = vld [vmem:[%s2786_s11 + $0x20] sm:$0xf] }
 0x298   :  { %v476_v3 = vpop.f32.mrf.mxu1  ;;  %v449_v11 = vpop.f32.mrf.mxu0 }
 0x299   :  { %v1943_v4 = vpop.eup %1942  ;;  %v483_v10 = vmax.f32 %v476_v3, 1e-30  ;;  %v1671_v3 = vld [vmem:[%s2786_s11 + $0xd0] sm:$0xf0] }
 0x29a   :  { %v490_v8 = vmul.f32 %v1943_v4, %v446_v1  ;;  %v1885_v1 = vld [vmem:[%s2786_s11 + $0xcc] sm:$0xf0] }
 0x29b   :  { %1944 = vrcp.f32 %v483_v10  ;;  %v1670_v4 = vor.u32 %v1885_v1, %v1669_v61  ;;  %v1866_v61 = vld [vmem:[%s2786_s11 + $0x34] sm:$0xf0] }
 0x29c   :  { %v493_v9 = vpack.c.bf16 %v490_v8, %v489_v5  ;;  %v1674_v5 = vor.u32 %v1883_v2, %v1671_v3  ;;  %v1884_v8 = vld [vmem:[%s2786_s11 + $0xcc] sm:$0xf]  ;;  %v1598_v1 = vor.u32 %v1866_v61, %v1597_v60  ;;  %v1865_v2 = vld [vmem:[%s2786_s11 + $0x2c] sm:$0xf0]  ;;  %v1863_v3 = vld [vmem:[%s2786_s11 + $0x24] sm:$0xf] }
 0x29d   :  { %886 = vmatpush.bf16.msra.mxu0 %v1670_v4  ;;  %v1591_v4 = vld [vmem:[%s2786_s11 + $0x30] sm:$0xf0] }
 0x29e   :  { %567 = vmatmul.bf16.vlgmr.msrb.gmra.mxu2 %v493_v9  ;;  %v1679_v9 = vld [vmem:[%s2786_s11 + $0xd8] sm:$0xf0]  ;;  %905 = vmatpush.bf16.msra.mxu1 %v1674_v5  ;;  %v1590_v5 = vor.u32 %v1865_v2, %v1589_v63  ;;  %v1921_v60 = vld [vmem:[%s2788_s13 + $0xf0] sm:$0xff]  ;;  %v1896_v2 = vld [vmem:[%s2788_s13 + $0x28] sm:$0xff] }
 0x29f   :  { %v1682_v10 = vor.u32 %v1884_v8, %v1679_v9  ;;  %v1594_v8 = vor.u32 %v1863_v3, %v1591_v4  ;;  %v1864_v9 = vld [vmem:[%s2786_s11 + $0x2c] sm:$0xf] }
 0x2a0   :  { %v478_v12 = vpop.f32.mrf.mxu1  ;;  %v451_v43 = vpop.f32.mrf.mxu0  ;;  %v1904_v3 = vld [vmem:[%s2788_s13 + $0x68] sm:$0xff] }
 0x2a1   :  { %v484_v36 = vmax.f32 %v478_v12, 1e-30  ;;  %v1945_v37 = vpop.eup %1944  ;;  %v1882_v12 = vld [vmem:[%s2786_s11 + $0xb4] sm:$0xf0]  ;;  %943 = vmatpush.bf16.msrb.mxu3 %v1682_v10  ;;  %v1599_v10 = vld [vmem:[%s2786_s11 + $0x38] sm:$0xf0] }
 0x2a2   :  { %v491_v13 = vmul.f32 %v1945_v37, %v449_v11  ;;  %v1661_v11 = vld [vmem:[%s2786_s11 + $0xa8] sm:$0xf] }
 0x2a3   :  { %1946 = vrcp.f32 %v484_v36  ;;  %v1653_v36 = vld [vmem:[%s2786_s11 + $0xa0] sm:$0xf]  ;;  %v1662_v37 = vor.u32 %v1882_v12, %v1661_v11  ;;  %v1602_v12 = vor.u32 %v1864_v9, %v1599_v10  ;;  %v1912_v9 = vld [vmem:[%s2788_s13 + $0xa8] sm:$0xff] }
 0x2a4   :  { %1948 = vrcp.f32 %v1992_v24  ;;  %v1875_v24 = vld [vmem:[%s2786_s11 + $0x84] sm:$0xf]  ;;  %v1920_v10 = vld [vmem:[%s2788_s13 + $0xe8] sm:$0xff] }
 0x2a5   :  { %925 = vmatpush.bf16.msra.mxu2 %v1662_v37  ;;  %v1581_v37 = vld [vmem:[%s2786_s11 + $0x8] sm:$0xf] }
 0x2a9   :  { %v1947_v42 = vpop.eup %1946 }
 0x2aa   :  { %v492_v14 = vmul.f32 %v1947_v42, %v451_v43  ;;  %v1949_v27 = vpop.eup %1948  ;;  %v1881_v42 = vld [vmem:[%s2786_s11 + $0xac] sm:$0xf0]  ;;  %v1879_v43 = vld [vmem:[%s2786_s11 + $0xa4] sm:$0xf] }
 0x2ab   :  { %v589_v28 = vmul.f32 128.0, %v1949_v27  ;;  %vm593_vm0 = vweird.f32 %v1949_v27 }
 0x2ac   :  { %v494_v15 = vpack.c.bf16 %v492_v14, %v491_v13  ;;  %v1655_v13 = vld [vmem:[%s2786_s11 + $0xb0] sm:$0xf0]  ;;  %v1654_v14 = vor.u32 %v1881_v42, %v1653_v36  ;;  %v1862_v42 = vld [vmem:[%s2786_s11 + $0x14] sm:$0xf0] }
 0x2ad   :  { %v590_v31 = vsub.f32 1.0, %v589_v28 }
 0x2ae   :  { %572 = vmatmul.bf16.gmra.mxu2 %v494_v15  ;;  %v1658_v15 = vor.u32 %v1879_v43, %v1655_v13  ;;  %887 = vmatpush.bf16.msra.mxu0 %v1654_v14  ;;  %v1573_v43 = vld [vmem:[%s2786_s11] sm:$0xf]  ;;  %v1582_v13 = vor.u32 %v1862_v42, %v1581_v37  ;;  %v1861_v14 = vld [vmem:[%s2786_s11 + $0xc] sm:$0xf0] }
 0x2af   :  { %v591_v32 = vmul.f32 %v1949_v27, %v590_v31  ;;  %v1903_v37 = vld [vmem:[%s2788_s13 + $0x60] sm:$0xff] }
 0x2b0   :  { %906 = vmatpush.bf16.msra.mxu1 %v1658_v15  ;;  %v1859_v15 = vld [vmem:[%s2786_s11 + $0x4] sm:$0xf] }
 0x321   :  { %v568_v47 = vpop.f32.mrf.mxu2 }
 0x322   :  { %v569_v48 = vadd.f32 %v568_v47, %v2149_v21  ;;  %v592_v21 = vadd.f32 %v1949_v27, %v591_v32  ;;  %v1880_v47 = vld [vmem:[%s2786_s11 + $0xac] sm:$0xf] }
 0x323   :  { %v1876_v32 = vld [vmem:[%s2786_s11 + $0x8c] sm:$0xf] }
 0x324   :  { %580 = vadd.xlane.f32.xlu2 %v569_v48  ;;  %v2390_v52 = vsel %vm593_vm0, %v1949_v27, %v592_v21  ;;  %v1639_v27 = vld [vmem:[%s2786_s11 + $0x90] sm:$0xf0]  ;;  %v1647_v21 = vld [vmem:[%s2786_s11 + $0x98] sm:$0xf0] }
 0x325   :  { %v1642_v31 = vor.u32 %v1875_v24, %v1639_v27 }
 0x327   :  { %907 = vmatpush.bf16.msra.mxu1 %v1642_v31 }
 0x329   :  { %v570_v16 = vpop.f32.mrf.mxu2 }
 0x32a   :  { %v571_v17 = vadd.f32 %v570_v16, %v2154_v22 }
 0x32c   :  { %582 = vadd.xlane.f32.xlu2 %v571_v17 }
 0x331   :  { %v573_v18 = vpop.f32.mrf.mxu2 }
 0x332   :  { %v574_v19 = vadd.f32 %v573_v18, %v2161_v25  ;;  %v1878_v18 = vld [vmem:[%s2786_s11 + $0x94] sm:$0xf0] }
 0x334   :  { %584 = vadd.xlane.f32.xlu0 %v574_v19 }
 0x339   :  { %v575_v20 = vpop.f32.mrf.mxu2 }
 0x33a   :  { %v576_v23 = vadd.f32 %v575_v20, %v2166_v26 }
 0x33c   :  { %586 = vadd.xlane.f32.xlu1 %v576_v23 }
 0x397   :  { %v581_v22 = vpop.xlane.xlu2 %580 }
 0x398   :  { %v595_v53 = vmul.f32 %v2390_v52, %v581_v22  ;;  %v1650_v22 = vor.u32 %v1876_v32, %v1647_v21 }
 0x39a   :  { %v2393_v57 = vsub.f32 %v569_v48, %v595_v53  ;;  %v1663_v48 = vld [vmem:[%s2786_s11 + $0xb8] sm:$0xf0]  ;;  %v1629_v53 = vld [vmem:[%s2786_s11 + $0x68] sm:$0xf] }
 0x39b   :  { %v1666_v16 = vor.u32 %v1880_v47, %v1663_v48  ;;  %v1575_v47 = vld [vmem:[%s2786_s11 + $0x10] sm:$0xf0] }
 0x39c   :  { %v603_v25 = vmul.f32 %v2393_v57, %v2393_v57 }
 0x39d   :  { %944 = vmatpush.bf16.msrb.mxu3 %v1666_v16  ;;  %v1574_v16 = vor.u32 %v1861_v14, %v1573_v43 }
 0x39e   :  { %607 = vadd.xlane.f32.xlu2 %v603_v25  ;;  %v1874_v25 = vld [vmem:[%s2786_s11 + $0x74] sm:$0xf0] }
 0x39f   :  { %v583_v26 = vpop.xlane.xlu2 %582 }
 0x3a0   :  { %v596_v58 = vmul.f32 %v2390_v52, %v583_v26  ;;  %v1621_v26 = vld [vmem:[%s2786_s11 + $0x60] sm:$0xf] }
 0x3a1   :  { %945 = vmatpush.bf16.msrb.mxu3 %v1650_v22 }
 0x3a2   :  { %v2398_v62 = vsub.f32 %v571_v17, %v596_v58  ;;  %v1645_v17 = vld [vmem:[%s2786_s11 + $0x88] sm:$0xf]  ;;  %v1630_v58 = vor.u32 %v1874_v25, %v1629_v53 }
 0x3a3   :  { %v1646_v20 = vor.u32 %v1878_v18, %v1645_v17  ;;  %v1578_v17 = vor.u32 %v1859_v15, %v1575_v47  ;;  %v1860_v18 = vld [vmem:[%s2786_s11 + $0xc] sm:$0xf] }
 0x3a4   :  { %v604_v0 = vmul.f32 %v2398_v62, %v2398_v62 }
 0x3a5   :  { %926 = vmatpush.bf16.msra.mxu2 %v1646_v20 }
 0x3a6   :  { %609 = vadd.xlane.f32.xlu0 %v604_v0  ;;  %v1873_v0 = vld [vmem:[%s2786_s11 + $0x6c] sm:$0xf0] }
 0x3a7   :  { %v585_v6 = vpop.xlane.xlu0 %584 }
 0x3a8   :  { %v597_v29 = vmul.f32 %v2390_v52, %v585_v6  ;;  %v1871_v6 = vld [vmem:[%s2786_s11 + $0x64] sm:$0xf] }
 0x3a9   :  { %927 = vmatpush.bf16.msra.mxu2 %v1630_v58 }
 0x3aa   :  { %v2403_v30 = vsub.f32 %v574_v19, %v597_v29  ;;  %v1637_v19 = vld [vmem:[%s2786_s11 + $0x80] sm:$0xf]  ;;  %v1623_v29 = vld [vmem:[%s2786_s11 + $0x70] sm:$0xf0] }
 0x3ac   :  { %v605_v7 = vmul.f32 %v2403_v30, %v2403_v30 }
 0x3ad   :  { %928 = vmatpush.bf16.msra.mxu2 %v1614_v45  ;;  %v1922_v45 = vld [vmem:[%s2788_s13 + $0xf8] sm:$0xff] }
 0x3ae   :  { %611 = vadd.xlane.f32.xlu1 %v605_v7  ;;  %v1622_v7 = vor.u32 %v1873_v0, %v1621_v26 }
 0x3af   :  { %v587_v33 = vpop.xlane.xlu1 %586 }
 0x3b0   :  { %v598_v34 = vmul.f32 %v2390_v52, %v587_v33  ;;  %v1626_v33 = vor.u32 %v1871_v6, %v1623_v29 }
 0x3b1   :  { %929 = vmatpush.bf16.msra.mxu2 %v1598_v1 }
 0x3b2   :  { %v2408_v35 = vsub.f32 %v576_v23, %v598_v34  ;;  %v1877_v23 = vld [vmem:[%s2786_s11 + $0x8c] sm:$0xf0]  ;;  %v1872_v34 = vld [vmem:[%s2786_s11 + $0x6c] sm:$0xf]  ;;  %908 = vmatpush.bf16.msra.mxu1 %v1626_v33 }
 0x3b3   :  { %v1638_v28 = vor.u32 %v1877_v23, %v1637_v19  ;;  %v1583_v19 = vld [vmem:[%s2786_s11 + $0x18] sm:$0xf0] }
 0x3b4   :  { %v606_v38 = vmul.f32 %v2408_v35, %v2408_v35  ;;  %v1586_v20 = vor.u32 %v1860_v18, %v1583_v19 }
 0x3b5   :  { %888 = vmatpush.bf16.msra.mxu0 %v1638_v28  ;;  %930 = vmatpush.bf16.msra.mxu2 %v1582_v13 }
 0x3b6   :  { %613 = vadd.xlane.f32.xlu2 %v606_v38  ;;  %v1631_v38 = vld [vmem:[%s2786_s11 + $0x78] sm:$0xf0]  ;;  %909 = vmatpush.bf16.msra.mxu1 %v1610_v54 }
 0x3b7   :  { %v1634_v39 = vor.u32 %v1872_v34, %v1631_v38 }
 0x3b9   :  { %889 = vmatpush.bf16.msra.mxu0 %v1622_v7  ;;  %946 = vmatpush.bf16.msrb.mxu3 %v1634_v39  ;;  %v1898_v39 = vld [vmem:[%s2788_s13 + $0x38] sm:$0xff]  ;;  %v1909_v7 = vld [vmem:[%s2788_s13 + $0x90] sm:$0xff] }
 0x3ba   :  { %910 = vmatpush.bf16.msra.mxu1 %v1594_v8  ;;  %1283 = vmatpush.bf16.msrb.mxu2 %v1914_v44  ;;  %v1928_v8 = vld [vmem:[%s2785_s10] ss:$0 sm:$0xff] }
 0x3bb   :  { %v1915_v44 = vld [vmem:[%s2788_s13 + $0xc0] sm:$0xff] }
 0x3bd   :  { %890 = vmatpush.bf16.msra.mxu0 %v1606_v51  ;;  %947 = vmatpush.bf16.msrb.mxu3 %v1618_v59  ;;  %v1913_v59 = vld [vmem:[%s2788_s13 + $0xb0] sm:$0xff] }
 0x3be   :  { %911 = vmatpush.bf16.msra.mxu1 %v1578_v17  ;;  %1284 = vmatpush.bf16.msrb.mxu2 %v1913_v59 }
 0x3c1   :  { %891 = vmatpush.bf16.msra.mxu0 %v1590_v5  ;;  %948 = vmatpush.bf16.msrb.mxu3 %v1602_v12 }
 0x3c2   :  { %1264 = vmatpush.bf16.msrb.mxu1 %v1906_v40  ;;  %1285 = vmatpush.bf16.msrb.mxu2 %v1912_v9  ;;  %v1916_v40 = vld [vmem:[%s2788_s13 + $0xc8] sm:$0xff] }
 0x3c5   :  { %892 = vmatpush.bf16.msra.mxu0 %v1574_v16  ;;  %949 = vmatpush.bf16.msrb.mxu3 %v1586_v20 }
 0x3c6   :  { %1265 = vmatpush.bf16.msrb.mxu1 %v1905_v50 }
 0x3c9   :  { %1245 = vmatpush.bf16.msrb.mxu0 %v1898_v39  ;;  %1302 = vmatpush.bf16.msra.mxu3 %v1922_v45  ;;  %v1908_v39 = vld [vmem:[%s2788_s13 + $0x88] sm:$0xff]  ;;  %v715_v45 = vld [vmem:[%s2787_s12] sm:$0xf] }
 0x3ca   :  { %1266 = vmatpush.bf16.msrb.mxu1 %v1904_v3  ;;  %v717_v50 = vperm.slane %v715_v45, 0 }
 0x3cd   :  { %1246 = vmatpush.bf16.msrb.mxu0 %v1897_v49  ;;  %1303 = vmatpush.bf16.msra.mxu3 %v1921_v60 }
 0x3ce   :  { %1267 = vmatpush.bf16.msrb.mxu1 %v1903_v37 }
 0x3d1   :  { %1247 = vmatpush.bf16.msrb.mxu0 %v1896_v2  ;;  %1304 = vmatpush.bf16.msra.mxu3 %v1920_v10  ;;  %v720_v2 = vperm.slane %v715_v45, 3 }
 0x411   :  { %v608_v11 = vpop.xlane.xlu2 %607 }
 0x412   :  { %v615_v36 = vmul.f32 %v608_v11, %v2390_v52 }
 0x414   :  { %v619_v48 = vadd.f32 1e-05, %v615_v36 }
 0x416   :  { %1950 = vrsqrt.f32 %v619_v48  ;;  %vm629_vm2 = vweird.f32 %v619_v48 }
 0x419   :  { %v610_v23 = vpop.xlane.xlu0 %609 }
 0x41a   :  { %v616_v24 = vmul.f32 %v610_v23, %v2390_v52 }
 0x41c   :  { %v1951_v27 = vpop.eup %1950  ;;  %v620_v28 = vadd.f32 1e-05, %v616_v24 }
 0x41d   :  { %v624_v31 = vmul.f32 %v1951_v27, %v619_v48  ;;  %vm630_vm1 = vweird.f32 %v1951_v27 }
 0x41e   :  { %1952 = vrsqrt.f32 %v620_v28  ;;  %vm2610_vm3 = vmor %vm629_vm2, %vm630_vm1  ;;  %vm639_vm5 = vweird.f32 %v620_v28 }
 0x41f   :  { %v625_v32 = vmul.f32 %v1951_v27, %v624_v31 }
 0x421   :  { %v626_v21 = vmul.f32 0.5, %v625_v32  ;;  %v612_v22 = vpop.xlane.xlu1 %611 }
 0x422   :  { %v617_v53 = vmul.f32 %v612_v22, %v2390_v52  ;;  %v1911_v22 = vld [vmem:[%s2788_s13 + $0xa0] sm:$0xff] }
 0x423   :  { %v627_v25 = vsub.f32 1.5, %v626_v21  ;;  %1286 = vmatpush.bf16.msrb.mxu2 %v1911_v22 }
 0x424   :  { %v1953_v26 = vpop.eup %1952  ;;  %v2607_v58 = vadd.f32 1e-05, %v617_v53  ;;  %v1919_v53 = vld [vmem:[%s2788_s13 + $0xe0] sm:$0xff] }
 0x425   :  { %v628_v0 = vmul.f32 %v1951_v27, %v627_v25  ;;  %v634_v6 = vmul.f32 %v1953_v26, %v620_v28  ;;  %vm640_vm4 = vweird.f32 %v1953_v26  ;;  %1305 = vmatpush.bf16.msra.mxu3 %v1919_v53  ;;  %v1893_v25 = vld [vmem:[%s2788_s13 + $0x10] sm:$0xff] }
 0x426   :  { %1954 = vrsqrt.f32 %v2607_v58  ;;  %vm641_vm6 = vmor %vm639_vm5, %vm640_vm4  ;;  %vm649_vm8 = vweird.f32 %v2607_v58 }
 0x427   :  { %v635_v29 = vmul.f32 %v1953_v26, %v634_v6  ;;  %v632_v33 = vsel %vm2610_vm3, %v1951_v27, %v628_v0  ;;  %v1918_v0 = vld [vmem:[%s2788_s13 + $0xd8] sm:$0xff]  ;;  %v1892_v6 = vld [vmem:[%s2788_s13 + $0x8] sm:$0xff] }
 0x428   :  { %v663_v54 = vmul.f32 %v632_v33, %v2393_v57  ;;  %v1917_v33 = vld [vmem:[%s2788_s13 + $0xd0] sm:$0xff] }
 0x429   :  { %v636_v34 = vmul.f32 0.5, %v635_v29  ;;  %v614_v38 = vpop.xlane.xlu2 %613  ;;  %1306 = vmatpush.bf16.msra.mxu3 %v1918_v0  ;;  %v1900_v29 = vld [vmem:[%s2788_s13 + $0x48] sm:$0xff] }
 0x42a   :  { %v618_v41 = vmul.f32 %v614_v38, %v2390_v52  ;;  %v670_v5 = vmul.f32 %v1927_v56, %v663_v54  ;;  %v1899_v38 = vld [vmem:[%s2788_s13 + $0x40] sm:$0xff] }
 0x42b   :  { %v637_v46 = vsub.f32 1.5, %v636_v34  ;;  %v1891_v34 = vld [vmem:[%s2788_s13] sm:$0xff] }
 0x42c   :  { %v1955_v51 = vpop.eup %1954  ;;  %v622_v55 = vadd.f32 1e-05, %v618_v41  ;;  %v2669_v43 = vadd.f32 %v1928_v8, %v670_v5  ;;  %v1907_v41 = vld [vmem:[%s2788_s13 + $0x80] sm:$0xff] }
 0x42d   :  { %v638_v61 = vmul.f32 %v1953_v26, %v637_v46  ;;  %v644_v63 = vmul.f32 %v1955_v51, %v2607_v58  ;;  %vm650_vm7 = vweird.f32 %v1955_v51  ;;  %v1910_v58 = vld [vmem:[%s2788_s13 + $0x98] sm:$0xff]  ;;  %1307 = vmatpush.bf16.msra.mxu3 %v1917_v33 }
 0x42e   :  { %1956 = vrsqrt.f32 %v622_v55  ;;  %vm651_vm9 = vmor %vm649_vm8, %vm650_vm7  ;;  %vm659_vm11 = vweird.f32 %v622_v55  ;;  %1287 = vmatpush.bf16.msrb.mxu2 %v1910_v58 }
 0x42f   :  { %v642_v57 = vsel %vm641_vm6, %v1953_v26, %v638_v61  ;;  %v645_v1 = vmul.f32 %v1955_v51, %v644_v63  ;;  %v1901_v26 = vld [vmem:[%s2788_s13 + $0x50] sm:$0xff] }
 0x430   :  { %v664_v4 = vmul.f32 %v642_v57, %v2398_v62  ;;  %v1895_v62 = vld [vmem:[%s2788_s13 + $0x20] sm:$0xff] }
 0x431   :  { %v646_v11 = vmul.f32 0.5, %v645_v1  ;;  %1248 = vmatpush.bf16.msrb.mxu0 %v1895_v62  ;;  %1308 = vmatpush.bf16.msra.mxu3 %v1916_v40  ;;  %v719_v1 = vperm.slane %v715_v45, 2 }
 0x432   :  { %v671_v12 = vmul.f32 %v1927_v56, %v664_v4  ;;  %1288 = vmatpush.bf16.msrb.mxu2 %v1909_v7 }
 0x433   :  { %v647_v36 = vsub.f32 1.5, %v646_v11 }
 0x434   :  { %v1957_v42 = vpop.eup %1956  ;;  %v2671_v13 = vadd.f32 %v1928_v8, %v671_v12 }
 0x435   :  { %v648_v14 = vmul.f32 %v1955_v51, %v647_v36  ;;  %v654_v15 = vmul.f32 %v1957_v42, %v622_v55  ;;  %vm660_vm10 = vweird.f32 %v1957_v42  ;;  %1309 = vmatpush.bf16.msra.mxu3 %v1915_v44 }
 0x436   :  { %v681_v47 = vpack.c.bf16 %v2671_v13, %v2669_v43  ;;  %vm661_vm12 = vmor %vm659_vm11, %vm660_vm10  ;;  %1289 = vmatpush.bf16.msrb.mxu2 %v1908_v39 }
 0x437   :  { %v655_v48 = vmul.f32 %v1957_v42, %v654_v15  ;;  %v652_v16 = vsel %vm651_vm9, %v1955_v51, %v648_v14  ;;  %v718_v51 = vperm.slane %v715_v45, 1 }
 0x438   :  { %893 = vmatmul.bf16.vlgmr.msra.gmra.mxu0 %v681_v47  ;;  %912 = vmatmul.bf16.vlgmr.msra.gmra.mxu1 %v681_v47  ;;  %v665_v19 = vmul.f32 %v652_v16, %v2403_v30  ;;  %v1894_v30 = vld [vmem:[%s2788_s13 + $0x18] sm:$0xff] }
 0x439   :  { %v656_v17 = vmul.f32 0.5, %v655_v48  ;;  %931 = vmatmul.bf16.vlgmr.msra.gmra.mxu2 %v681_v47  ;;  %950 = vmatmul.bf16.vlgmr.msrb.gmra.mxu3 %v681_v47 }
 0x43a   :  { %v672_v27 = vmul.f32 %v1927_v56, %v665_v19  ;;  %1249 = vmatpush.bf16.msrb.mxu0 %v1894_v30  ;;  %1290 = vmatpush.bf16.msrb.mxu2 %v1907_v41 }
 0x43b   :  { %v657_v18 = vsub.f32 1.5, %v656_v17 }
 0x43c   :  { %v2678_v31 = vadd.f32 %v1928_v8, %v672_v27 }
 0x43d   :  { %v658_v20 = vmul.f32 %v1957_v42, %v657_v18 }
 0x43e   :  { %1250 = vmatpush.bf16.msrb.mxu0 %v1893_v25 }
 0x43f   :  { %v662_v23 = vsel %vm661_vm12, %v1957_v42, %v658_v20 }
 0x440   :  { %v666_v24 = vmul.f32 %v662_v23, %v2408_v35  ;;  %v1902_v35 = vld [vmem:[%s2788_s13 + $0x58] sm:$0xff] }
 0x441   :  { %1268 = vmatpush.bf16.msrb.mxu1 %v1902_v35 }
 0x442   :  { %v673_v28 = vmul.f32 %v1927_v56, %v666_v24  ;;  %1251 = vmatpush.bf16.msrb.mxu0 %v1892_v6 }
 0x444   :  { %v2680_v32 = vadd.f32 %v1928_v8, %v673_v28 }
 0x445   :  { %1269 = vmatpush.bf16.msrb.mxu1 %v1901_v26 }
 0x446   :  { %v682_v21 = vpack.c.bf16 %v2680_v32, %v2678_v31  ;;  %1252 = vmatpush.bf16.msrb.mxu0 %v1891_v34 }
 0x448   :  { %898 = vmatmul.bf16.gmra.mxu0 %v682_v21  ;;  %917 = vmatmul.bf16.gmra.mxu1 %v682_v21 }
 0x449   :  { %936 = vmatmul.bf16.gmra.mxu2 %v682_v21  ;;  %955 = vmatmul.bf16.gmra.mxu3 %v682_v21 }
 0x44a   :  { %1270 = vmatpush.bf16.msrb.mxu1 %v1900_v29 }
 0x44e   :  { %1271 = vmatpush.bf16.msrb.mxu1 %v1899_v38 }
 0x4b5   :  { %v894_v46 = vpop.f32.mrf.mxu0  ;;  %v913_v49 = vpop.f32.mrf.mxu1 }
 0x4b6   :  { %v895_v54 = vadd.f32 %v894_v46, %v717_v50  ;;  %v914_v55 = vadd.f32 %v913_v49, %v718_v51 }
 0x4b8   :  { %v961_v3 = vmax.f32 %v895_v54, 0.0  ;;  %v962_v4 = vmax.f32 %v914_v55, 0.0 }
 0x4bc   :  { %v932_v56 = vpop.f32.mrf.mxu2  ;;  %v951_v59 = vpop.f32.mrf.mxu3 }
 0x4bd   :  { %v896_v60 = vpop.f32.mrf.mxu0  ;;  %v915_v61 = vpop.f32.mrf.mxu1  ;;  %v933_v11 = vadd.f32 %v932_v56, %v719_v1  ;;  %v952_v12 = vadd.f32 %v951_v59, %v720_v2 }
 0x4be   :  { %v897_v63 = vadd.f32 %v896_v60, %v717_v50  ;;  %v916_v57 = vadd.f32 %v915_v61, %v718_v51 }
 0x4bf   :  { %v963_v47 = vmax.f32 %v933_v11, 0.0  ;;  %v964_v48 = vmax.f32 %v952_v12, 0.0 }
 0x4c0   :  { %v965_v5 = vmax.f32 %v897_v63, 0.0  ;;  %v966_v8 = vmax.f32 %v916_v57, 0.0 }
 0x4c2   :  { %v977_v9 = vpack.c.bf16 %v965_v5, %v961_v3  ;;  %v978_v10 = vpack.c.bf16 %v966_v8, %v962_v4 }
 0x4c4   :  { %v934_v36 = vpop.f32.mrf.mxu2  ;;  %v953_v62 = vpop.f32.mrf.mxu3  ;;  %1253 = vmatmul.bf16.vlgmr.msrb.gmra.mxu0 %v977_v9  ;;  %1272 = vmatmul.bf16.vlgmr.msrb.gmra.mxu1 %v978_v10 }
 0x4c5   :  { %v935_v37 = vadd.f32 %v934_v36, %v719_v1  ;;  %v954_v42 = vadd.f32 %v953_v62, %v720_v2  ;;  %v899_v14 = vpop.f32.mrf.mxu0  ;;  %v918_v15 = vpop.f32.mrf.mxu1 }
 0x4c6   :  { %v900_v20 = vadd.f32 %v899_v14, %v717_v50  ;;  %v919_v23 = vadd.f32 %v918_v15, %v718_v51 }
 0x4c7   :  { %v967_v16 = vmax.f32 %v935_v37, 0.0  ;;  %v968_v17 = vmax.f32 %v954_v42, 0.0 }
 0x4c8   :  { %v969_v22 = vmax.f32 %v900_v20, 0.0  ;;  %v970_v53 = vmax.f32 %v919_v23, 0.0 }
 0x4c9   :  { %v979_v18 = vpack.c.bf16 %v967_v16, %v963_v47  ;;  %v980_v19 = vpack.c.bf16 %v968_v17, %v964_v48 }
 0x4cb   :  { %1291 = vmatmul.bf16.vlgmr.msrb.gmra.mxu2 %v979_v18  ;;  %1310 = vmatmul.bf16.vlgmr.msra.gmra.mxu3 %v980_v19 }
 0x4cc   :  { %v937_v24 = vpop.f32.mrf.mxu2  ;;  %v956_v27 = vpop.f32.mrf.mxu3 }
 0x4cd   :  { %v901_v28 = vpop.f32.mrf.mxu0  ;;  %v920_v21 = vpop.f32.mrf.mxu1  ;;  %v938_v6 = vadd.f32 %v937_v24, %v719_v1  ;;  %v957_v29 = vadd.f32 %v956_v27, %v720_v2 }
 0x4ce   :  { %v902_v30 = vadd.f32 %v901_v28, %v717_v50  ;;  %v921_v35 = vadd.f32 %v920_v21, %v718_v51  ;;  %v1929_v50 = vld [vmem:[%s2789_s14] ss:$0 sm:$0xff] }
 0x4cf   :  { %v971_v39 = vmax.f32 %v938_v6, 0.0  ;;  %v972_v40 = vmax.f32 %v957_v29, 0.0 }
 0x4d0   :  { %v973_v25 = vmax.f32 %v902_v30, 0.0  ;;  %v974_v26 = vmax.f32 %v921_v35, 0.0 }
 0x4d2   :  { %v981_v58 = vpack.c.bf16 %v973_v25, %v969_v22  ;;  %v982_v0 = vpack.c.bf16 %v974_v26, %v970_v53 }
 0x4d4   :  { %v939_v7 = vpop.f32.mrf.mxu2  ;;  %v958_v33 = vpop.f32.mrf.mxu3  ;;  %1258 = vmatmul.bf16.gmra.mxu0 %v981_v58  ;;  %1277 = vmatmul.bf16.gmra.mxu1 %v982_v0 }
 0x4d5   :  { %v940_v34 = vadd.f32 %v939_v7, %v719_v1  ;;  %v959_v38 = vadd.f32 %v958_v33, %v720_v2 }
 0x4d7   :  { %v975_v41 = vmax.f32 %v940_v34, 0.0  ;;  %v976_v44 = vmax.f32 %v959_v38, 0.0 }
 0x4d9   :  { %v983_v45 = vpack.c.bf16 %v975_v41, %v971_v39  ;;  %v984_v46 = vpack.c.bf16 %v976_v44, %v972_v40 }
 0x4db   :  { %1296 = vmatmul.bf16.gmra.mxu2 %v983_v45  ;;  %1315 = vmatmul.bf16.gmra.mxu3 %v984_v46 }
 0x541   :  { %v1254_v49 = vpop.f32.mrf.mxu0  ;;  %v1273_v51 = vpop.f32.mrf.mxu1 }
 0x542   :  { %v1255_v54 = vadd.f32 %v1929_v50, %v1254_v49 }
 0x544   :  { %v1274_v56 = vadd.f32 %v1273_v51, %v1255_v54 }
 0x549   :  { %v1256_v55 = vpop.f32.mrf.mxu0  ;;  %v1275_v63 = vpop.f32.mrf.mxu1 }
 0x54a   :  { %v1257_v57 = vadd.f32 %v1929_v50, %v1256_v55 }
 0x54c   :  { %v1276_v4 = vadd.f32 %v1275_v63, %v1257_v57  ;;  %v1931_v57 = vld [vmem:[%s2791_s16] ss:$0 sm:$0xff] }
 0x54e   :  { %v1292_v59 = vpop.f32.mrf.mxu2  ;;  %v1311_v60 = vpop.f32.mrf.mxu3 }
 0x54f   :  { %v1293_v61 = vadd.f32 %v1292_v59, %v1274_v56 }
 0x551   :  { %v1312_v1 = vadd.f32 %v1311_v60, %v1293_v61  ;;  %v1259_v2 = vpop.f32.mrf.mxu0  ;;  %v1278_v12 = vpop.f32.mrf.mxu1  ;;  %v1930_v60 = vld [vmem:[%s2790_s15] ss:$0 sm:$0xff]  ;;  %s1993_s15 = smov [#allocation2]  }
 0x552   :  { %v1260_v10 = vadd.f32 %v1929_v50, %v1259_v2  ;;  %s1429_s16 = sshll.u32 %s1993_s15, 4  ;;  %s1430_s16 = int_to_ptr.vmem [resolvable:$true] %s1429_s16 }
 0x553   :  { %v1321_v3 = vadd.f32 %v1312_v1, %v2669_v43 }
 0x554   :  { %v1279_v62 = vadd.f32 %v1278_v12, %v1260_v10 }
 0x555   :  { %1327 = vadd.xlane.f32.xlu0 %v1321_v3 }
 0x556   :  { %v1294_v5 = vpop.f32.mrf.mxu2  ;;  %v1313_v8 = vpop.f32.mrf.mxu3 }
 0x557   :  { %v1295_v9 = vadd.f32 %v1294_v5, %v1276_v4 }
 0x559   :  { %v1314_v11 = vadd.f32 %v1313_v8, %v1295_v9  ;;  %v1261_v37 = vpop.f32.mrf.mxu0  ;;  %v1280_v16 = vpop.f32.mrf.mxu1 }
 0x55a   :  { %v1262_v47 = vadd.f32 %v1929_v50, %v1261_v37 }
 0x55b   :  { %v1322_v36 = vadd.f32 %v1314_v11, %v2671_v13 }
 0x55c   :  { %v1281_v17 = vadd.f32 %v1280_v16, %v1262_v47 }
 0x55d   :  { %1329 = vadd.xlane.f32.xlu1 %v1322_v36 }
 0x55e   :  { %v1297_v42 = vpop.f32.mrf.mxu2  ;;  %v1316_v14 = vpop.f32.mrf.mxu3 }
 0x55f   :  { %v1298_v15 = vadd.f32 %v1297_v42, %v1279_v62 }
 0x561   :  { %v1317_v48 = vadd.f32 %v1316_v14, %v1298_v15 }
 0x563   :  { %v1323_v43 = vadd.f32 %v1317_v48, %v2678_v31 }
 0x565   :  { %1331 = vadd.xlane.f32.xlu2 %v1323_v43 }
 0x566   :  { %v1299_v18 = vpop.f32.mrf.mxu2  ;;  %v1318_v20 = vpop.f32.mrf.mxu3 }
 0x567   :  { %v1300_v19 = vadd.f32 %v1299_v18, %v1281_v17 }
 0x569   :  { %v1319_v23 = vadd.f32 %v1318_v20, %v1300_v19 }
 0x56b   :  { %v1324_v24 = vadd.f32 %v1319_v23, %v2680_v32 }
 0x56d   :  { %1333 = vadd.xlane.f32.xlu0 %v1324_v24 }
 0x5c8   :  { %v1328_v13 = vpop.xlane.xlu0 %1327 }
 0x5c9   :  { %v1335_v27 = vmul.f32 %v1328_v13, %v2390_v52 }
 0x5cb   :  { %v1339_v28 = vsub.f32 %v1321_v3, %v1335_v27 }
 0x5cd   :  { %v1343_v21 = vmul.f32 %v1339_v28, %v1339_v28 }
 0x5cf   :  { %1347 = vadd.xlane.f32.xlu1 %v1343_v21 }
 0x5d0   :  { %v1330_v30 = vpop.xlane.xlu1 %1329 }
 0x5d1   :  { %v1336_v35 = vmul.f32 %v1330_v30, %v2390_v52 }
 0x5d3   :  { %v1340_v31 = vsub.f32 %v1322_v36, %v1336_v35 }
 0x5d5   :  { %v1344_v22 = vmul.f32 %v1340_v31, %v1340_v31 }
 0x5d7   :  { %1349 = vadd.xlane.f32.xlu2 %v1344_v22 }
 0x5d8   :  { %v1332_v53 = vpop.xlane.xlu2 %1331 }
 0x5d9   :  { %v1337_v25 = vmul.f32 %v1332_v53, %v2390_v52 }
 0x5db   :  { %v2751_v26 = vsub.f32 %v1323_v43, %v1337_v25 }
 0x5dd   :  { %v1345_v32 = vmul.f32 %v2751_v26, %v2751_v26 }
 0x5df   :  { %1351 = vadd.xlane.f32.xlu0 %v1345_v32 }
 0x5e0   :  { %v1334_v58 = vpop.xlane.xlu0 %1333 }
 0x5e1   :  { %v1338_v0 = vmul.f32 %v1334_v58, %v2390_v52 }
 0x5e3   :  { %v2756_v6 = vsub.f32 %v1324_v24, %v1338_v0 }
 0x5e5   :  { %v1346_v29 = vmul.f32 %v2756_v6, %v2756_v6 }
 0x5e7   :  { %1353 = vadd.xlane.f32.xlu1 %v1346_v29 }
 0x642   :  { %v1348_v7 = vpop.xlane.xlu1 %1347 }
 0x643   :  { %v1355_v33 = vmul.f32 %v1348_v7, %v2390_v52 }
 0x645   :  { %v1359_v34 = vadd.f32 1e-05, %v1355_v33 }
 0x647   :  { %1958 = vrsqrt.f32 %v1359_v34  ;;  %vm1369_vm14 = vweird.f32 %v1359_v34 }
 0x64a   :  { %v1350_v38 = vpop.xlane.xlu2 %1349 }
 0x64b   :  { %v1356_v39 = vmul.f32 %v1350_v38, %v2390_v52 }
 0x64d   :  { %v1959_v40 = vpop.eup %1958  ;;  %v1360_v41 = vadd.f32 1e-05, %v1356_v39 }
 0x64e   :  { %v1364_v44 = vmul.f32 %v1959_v40, %v1359_v34  ;;  %vm1370_vm13 = vweird.f32 %v1959_v40 }
 0x64f   :  { %1960 = vrsqrt.f32 %v1360_v41  ;;  %vm1371_vm15 = vmor %vm1369_vm14, %vm1370_vm13  ;;  %vm1379_vm1 = vweird.f32 %v1360_v41 }
 0x650   :  { %v1365_v45 = vmul.f32 %v1959_v40, %v1364_v44 }
 0x652   :  { %v1366_v46 = vmul.f32 0.5, %v1365_v45  ;;  %v1352_v49 = vpop.xlane.xlu0 %1351 }
 0x653   :  { %v1357_v50 = vmul.f32 %v1352_v49, %v2390_v52 }
 0x654   :  { %v1367_v51 = vsub.f32 1.5, %v1366_v46 }
 0x655   :  { %v1961_v54 = vpop.eup %1960  ;;  %v1361_v55 = vadd.f32 1e-05, %v1357_v50 }
 0x656   :  { %v1368_v56 = vmul.f32 %v1959_v40, %v1367_v51  ;;  %v1374_v59 = vmul.f32 %v1961_v54, %v1360_v41  ;;  %vm1380_vm0 = vweird.f32 %v1961_v54 }
 0x657   :  { %1962 = vrsqrt.f32 %v1361_v55  ;;  %vm1381_vm2 = vmor %vm1379_vm1, %vm1380_vm0  ;;  %vm1389_vm4 = vweird.f32 %v1361_v55 }
 0x658   :  { %v1372_v61 = vsel %vm1371_vm15, %v1959_v40, %v1368_v56  ;;  %v1375_v63 = vmul.f32 %v1961_v54, %v1374_v59 }
 0x659   :  { %v1403_v1 = vmul.f32 %v1372_v61, %v1339_v28 }
 0x65a   :  { %v1376_v2 = vmul.f32 0.5, %v1375_v63  ;;  %v1354_v3 = vpop.xlane.xlu1 %1353 }
 0x65b   :  { %v1410_v4 = vmul.f32 %v1930_v60, %v1403_v1  ;;  %v1358_v5 = vmul.f32 %v1354_v3, %v2390_v52 }
 0x65c   :  { %v1377_v8 = vsub.f32 1.5, %v1376_v2 }
 0x65d   :  { %v1963_v9 = vpop.eup %1962  ;;  %v1417_v10 = vadd.f32 %v1931_v57, %v1410_v4  ;;  %v1362_v11 = vadd.f32 1e-05, %v1358_v5 }
 0x65e   :  { %v1378_v12 = vmul.f32 %v1961_v54, %v1377_v8  ;;  %v1384_v36 = vmul.f32 %v1963_v9, %v1361_v55  ;;  %vm1390_vm3 = vweird.f32 %v1963_v9 }
 0x65f   :  { %1421 = vst [vmem:[#allocation2] sm:$0xff] %v1417_v10  ;;  %1964 = vrsqrt.f32 %v1362_v11  ;;  %vm1391_vm5 = vmor %vm1389_vm4, %vm1390_vm3  ;;  %vm1399_vm7 = vweird.f32 %v1362_v11 }
 0x660   :  { %v1382_v62 = vsel %vm1381_vm2, %v1961_v54, %v1378_v12  ;;  %v1385_v37 = vmul.f32 %v1963_v9, %v1384_v36 }
 0x661   :  { %v1404_v42 = vmul.f32 %v1382_v62, %v1340_v31 }
 0x662   :  { %v1386_v14 = vmul.f32 0.5, %v1385_v37 }
 0x663   :  { %v1411_v15 = vmul.f32 %v1930_v60, %v1404_v42 }
 0x664   :  { %v1387_v47 = vsub.f32 1.5, %v1386_v14 }
 0x665   :  { %v1965_v48 = vpop.eup %1964  ;;  %v1418_v52 = vadd.f32 %v1931_v57, %v1411_v15 }
 0x666   :  { %v1388_v43 = vmul.f32 %v1963_v9, %v1387_v47  ;;  %v1394_v16 = vmul.f32 %v1965_v48, %v1362_v11  ;;  %vm1400_vm6 = vweird.f32 %v1965_v48 }
 0x667   :  { %1422 = vst [vmem:[#allocation2 + $0x8] sm:$0xff] %v1418_v52  ;;  %vm1401_vm8 = vmor %vm1399_vm7, %vm1400_vm6 }
 0x668   :  { %v1392_v17 = vsel %vm1391_vm5, %v1963_v9, %v1388_v43  ;;  %v1395_v18 = vmul.f32 %v1965_v48, %v1394_v16 }
 0x669   :  { %v1405_v19 = vmul.f32 %v1392_v17, %v2751_v26 }
 0x66a   :  { %v1396_v20 = vmul.f32 0.5, %v1395_v18 }
 0x66b   :  { %v1412_v23 = vmul.f32 %v1930_v60, %v1405_v19 }
 0x66c   :  { %v1397_v24 = vsub.f32 1.5, %v1396_v20 }
 0x66d   :  { %v1419_v13 = vadd.f32 %v1931_v57, %v1412_v23 }
 0x66e   :  { %v1398_v27 = vmul.f32 %v1965_v48, %v1397_v24 }
 0x66f   :  { %1423 = vst [vmem:[#allocation2 + $0x10] sm:$0xff] %v1419_v13 }
 0x670   :  { %v1402_v28 = vsel %vm1401_vm8, %v1965_v48, %v1398_v27 }
 0x671   :  { %v1406_v21 = vmul.f32 %v1402_v28, %v2756_v6 }
 0x673   :  { %v1413_v30 = vmul.f32 %v1930_v60, %v1406_v21 }
 0x675   :  { %v1420_v35 = vadd.f32 %v1931_v57, %v1413_v30 }
 0x677   :  { %1424 = vst [vmem:[#allocation2 + $0x18] sm:$0xff] %v1420_v35 }
 0x678   :  { %1437 = dma.vmem_to_hbm [thread:$0]  %s1430_s16, 512, %s1432_s28, [#allocation3], %s1994_s29, %s1994_s29, %s1995_s0  }
 0x679   :  { %1990 = dma.done.wait [#allocation3], 512  }
 0x67a   :  { %1991 = vsyncadd [#allocation3], 4294966784 }
 0x67b   :  { %1442 = vsyncpa [#allocation3], 1 }

</bundles_post_ra>
